<compile_context>
chip_gen: v7x
topology: tpu7x:2x2x1
jax: 0.10.0
libtpu: 0.0.40
codegen_flags: <defaults>
</compile_context>

<pallas_src>
import functools

import numpy as np
import jax
import jax.numpy as jnp
from jax.experimental import pallas as pl
from jax.experimental.pallas import tpu as pltpu

EPS = 1e-5
HIGHEST = jax.lax.Precision.HIGHEST   # only used by the pure-JAX reference

K = 5           # conv kernel size
PAD = K // 2    # 'same' padding
BBLK = 8        # images per grid step
WPAD = 32       # padded input width (>= H + 2*PAD, rounder matmul K)
NCPAD = 128     # classes padded to a full lane tile for the output store


# ----------------------------- fused Pallas kernel --------------------------

def _convnet_kernel(xp_ref, w1_ref, s1_ref, t1_ref, w2_ref, s2_ref, t2_ref,
                    wfc_ref, bfc_ref, o_ref):
    Hp, Bblk, Wp = xp_ref.shape            # (H+4, BBLK, WPAD)
    H = Hp - (K - 1)                       # 16
    H1, H2 = H // 2, H // 4                # 8, 4
    WC1 = s1_ref.shape[1]                  # H  * C1 = 256   lanes = (w,  c1)
    WC2 = s2_ref.shape[1]                  # H1 * C2 = 256   lanes = (w2, c2)
    C1 = WC1 // H                          # 16
    C2 = WC2 // H1                         # 32

    # ---- layer1: 5x5 conv (1 -> C1) as K accumulated f32 MXU matmuls (one
    #      per kh tap) against a width-Toeplitz weight.  rows = (h, b).
    acc1 = jnp.zeros((H * Bblk, WC1), jnp.float32)
    for dh in range(K):
        lhs = xp_ref[dh:dh + H].reshape(H * Bblk, Wp)          # (128, 32)
        acc1 = acc1 + jnp.dot(lhs, w1_ref[dh],
                              preferred_element_type=jnp.float32)
    y1 = jnp.maximum(acc1 * s1_ref[...] + t1_ref[...], 0.0)    # BN1 + ReLU

    # ---- pool1 (2x2): rows -> pair max; lanes -> roll(-C1) + max.  Pooled
    #      values land in even-w lane groups; odd groups hold stale values
    #      that only ever meet zero rows of the layer-2 weight matrix.
    y1 = y1.reshape(H1, 2, Bblk, WC1)
    y1 = jnp.maximum(y1[:, 0], y1[:, 1])                       # (H1, B, WC1)
    y1 = jnp.maximum(y1, jnp.roll(y1, -C1, axis=-1))

    # ---- layer2: 5x5 conv (C1 -> C2) as ONE bf16 MXU matmul, K = 5*WC1.
    #      im2col = leading-dim slices + 256-lane-aligned concat (no shuffles,
    #      no VMEM scratch), f32 accumulation in the MXU.
    zeros = jnp.zeros((PAD, Bblk, WC1), jnp.float32)
    z1p = jnp.concatenate([zeros, y1, zeros], axis=0)          # (H1+4, B, WC1)
    lhs2 = jnp.concatenate(
        [z1p[dh:dh + H1].reshape(H1 * Bblk, WC1) for dh in range(K)], axis=-1)
    y2 = jnp.dot(lhs2.astype(jnp.bfloat16), w2_ref[...],
                 preferred_element_type=jnp.float32)           # (64, 256)
    y2 = jnp.maximum(y2 * s2_ref[...] + t2_ref[...], 0.0)      # BN2 + ReLU

    # ---- pool2 (2x2): same row-pair / lane-roll trick.
    y2 = y2.reshape(H2, 2, Bblk, WC2)
    y2 = jnp.maximum(y2[:, 0], y2[:, 1])                       # (H2, B, WC2)
    y2 = jnp.maximum(y2, jnp.roll(y2, -C2, axis=-1))

    # ---- fc: one (BBLK, H2*WC2) x (H2*WC2, NCPAD) f32 MXU matmul; stale
    #      odd-w2 lane groups meet zero weight rows, torch's (C,H,W) flatten
    #      order is folded into wfc's host-side layout.  Lane-dense store.
    z2 = jnp.concatenate([y2[h] for h in range(H2)], axis=-1)  # (BBLK, 1024)
    o_ref[...] = (jnp.dot(z2, wfc_ref[...],
                          preferred_element_type=jnp.float32) + bfc_ref[...])


@functools.partial(jax.jit, static_argnames=("num_classes",))
def convnet_forward(x, params, num_classes=10):
    """x: (B, 1, H, H) float32 -> logits (B, num_classes)."""
    # TODO(synk): BatchNorm uses inference (running-stats) semantics; training-
    # mode batch statistics are not computed.
    B, _, H, _ = x.shape
    assert B % BBLK == 0, "batch must be a multiple of BBLK"
    Hp = H + 2 * PAD

    # 'same' padding + width padding + transpose to (hp, b, wp) so kernel rows
    # are (h, b).  A few KiB of host-side glue per image.
    xp = jnp.pad(x[:, 0], ((0, 0), (PAD, PAD), (PAD, PAD)))        # (B,20,20)
    xp = jnp.pad(xp, ((0, 0), (0, 0), (0, WPAD - Hp)))             # (B,20,32)
    xp = jnp.transpose(xp, (1, 0, 2))                              # (20,B,32)

    out = pl.pallas_call(
        _convnet_kernel,
        out_shape=jax.ShapeDtypeStruct((B, NCPAD), jnp.float32),
        grid=(B // BBLK,),
        in_specs=[
            pl.BlockSpec((Hp, BBLK, WPAD), lambda i: (0, i, 0)),
            pl.BlockSpec(params["w1t"].shape, lambda i: (0, 0, 0)),
            pl.BlockSpec(params["s1"].shape, lambda i: (0, 0)),
            pl.BlockSpec(params["t1"].shape, lambda i: (0, 0)),
            pl.BlockSpec(params["w2t"].shape, lambda i: (0, 0)),
            pl.BlockSpec(params["s2"].shape, lambda i: (0, 0)),
            pl.BlockSpec(params["t2"].shape, lambda i: (0, 0)),
            pl.BlockSpec(params["wfc"].shape, lambda i: (0, 0)),
            pl.BlockSpec(params["bfc"].shape, lambda i: (0, 0)),
        ],
        out_specs=pl.BlockSpec((BBLK, NCPAD), lambda i: (i, 0)),
        compiler_params=pltpu.CompilerParams(
            dimension_semantics=("parallel",)),
    )(xp, params["w1t"], params["s1"], params["t1"],
      params["w2t"], params["s2"], params["t2"],
      params["wfc"], params["bfc"])
    return out[:, :num_classes]


# ------------------------------ params & reference --------------------------

def init_params(key, num_classes=10, in_hw=16):
    H = in_hw
    H1, H2 = H // 2, H // 4
    C1, C2 = 16, 32
    ks = jax.random.split(key, 6)
    raw = dict(
        w1=jax.random.normal(ks[0], (C1, 1, K, K), jnp.float32) * 0.1,
        b1=jax.random.normal(ks[1], (C1,), jnp.float32) * 0.1,
        w2=jax.random.normal(ks[2], (C2, C1, K, K), jnp.float32) * 0.05,
        b2=jax.random.normal(ks[3], (C2,), jnp.float32) * 0.1,
        # BatchNorm2d default init (gamma=1, beta=0, running_mean=0, var=1)
        g1=jnp.ones((C1,), jnp.float32), be1=jnp.zeros((C1,), jnp.float32),
        m1=jnp.zeros((C1,), jnp.float32), v1=jnp.ones((C1,), jnp.float32),
        g2=jnp.ones((C2,), jnp.float32), be2=jnp.zeros((C2,), jnp.float32),
        m2=jnp.zeros((C2,), jnp.float32), v2=jnp.ones((C2,), jnp.float32),
        wfc=jax.random.normal(ks[4], (num_classes, C2 * H2 * H2),
                              jnp.float32) * 0.05,
        bfc=jax.random.normal(ks[5], (num_classes,), jnp.float32) * 0.1,
    )

    # ---- fold conv bias + BN (running stats) into per-channel scale/shift.
    s1 = np.asarray(raw["g1"] / jnp.sqrt(raw["v1"] + EPS))
    t1 = np.asarray(raw["be1"]) + (np.asarray(raw["b1"]) - np.asarray(raw["m1"])) * s1
    s2 = np.asarray(raw["g2"] / jnp.sqrt(raw["v2"] + EPS))
    t2 = np.asarray(raw["be2"]) + (np.asarray(raw["b2"]) - np.asarray(raw["m2"])) * s2

    # ---- layer1 width-Toeplitz weight: rows (kh, wp), cols (w, c1).
    w1r = np.asarray(raw["w1"])                              # (C1,1,K,K)
    w1t = np.zeros((K, WPAD, H, C1), np.float32)
    for dh in range(K):
        for dw in range(K):
            for w in range(H):
                w1t[dh, w + dw, w, :] = w1r[:, 0, dh, dw]
    w1t = w1t.reshape(K, WPAD, H * C1)

    # ---- layer2 width-Toeplitz weight over the *unpooled* width grid (pool1
    #      leaves pooled values at even-w lane groups; odd groups get zero
    #      rows): rows (kh, wraw, c1), cols (w2, c2).
    w2r = np.asarray(raw["w2"])                              # (C2,C1,K,K)
    w2t = np.zeros((K, H, C1, H1, C2), np.float32)
    for dh in range(K):
        for dw in range(K):
            for w2 in range(H1):
                wp = w2 + dw                                 # padded pooled col
                if PAD <= wp < PAD + H1:
                    w2t[dh, 2 * (wp - PAD), :, w2, :] = w2r[:, :, dh, dw].T
    w2t = w2t.reshape(K * H * C1, H1 * C2)

    # ---- FC weight: rows (h3, w2raw, c2) over the unpooled-w2 grid (odd
    #      groups zero), cols padded to NCPAD; torch (C,H,W) flatten folded in.
    wfcr = np.asarray(raw["wfc"]).reshape(num_classes, C2, H2, H2)
    wfcm = np.zeros((H2, H1, C2, NCPAD), np.float32)
    for h3 in range(H2):
        for w3 in range(H2):
            wfcm[h3, 2 * w3, :, :num_classes] = wfcr[:, :, h3, w3].T
    wfcm = wfcm.reshape(H2 * H1 * C2, NCPAD)

    bfcp = np.zeros((1, NCPAD), np.float32)
    bfcp[0, :num_classes] = np.asarray(raw["bfc"])

    params = dict(
        w1t=jnp.asarray(w1t),                                 # (5, 32, 256) f32
        w2t=jnp.asarray(w2t, dtype=jnp.bfloat16),             # (1280, 256) bf16
        wfc=jnp.asarray(wfcm),                                # (1024, 128) f32
        bfc=jnp.asarray(bfcp),                                # (1, 128)    f32
        s1=jnp.asarray(np.tile(s1, H)[None, :]),              # (1, 256) lane=(w,c1)
        t1=jnp.asarray(np.tile(t1, H)[None, :]),
        s2=jnp.asarray(np.tile(s2, H1)[None, :]),             # (1, 256) lane=(w2,c2)
        t2=jnp.asarray(np.tile(t2, H1)[None, :]),
    )
    return params, raw


def reference_forward(x, raw):
    """Pure-JAX reference matching the PyTorch forward (eval-mode BN)."""
    def conv(x, w, b):
        y = jax.lax.conv_general_dilated(
            x, w, (1, 1), ((PAD, PAD), (PAD, PAD)),
            dimension_numbers=("NCHW", "OIHW", "NCHW"), precision=HIGHEST)
        return y + b[None, :, None, None]

    def bn(x, g, be, m, v):
        return ((x - m[None, :, None, None])
                / jnp.sqrt(v[None, :, None, None] + EPS)
                * g[None, :, None, None] + be[None, :, None, None])

    def pool(x):
        return jax.lax.reduce_window(x, -jnp.inf, jax.lax.max,
                                     (1, 1, 2, 2), (1, 1, 2, 2), "VALID")

    y = pool(jnp.maximum(bn(conv(x, raw["w1"], raw["b1"]),
                            raw["g1"], raw["be1"], raw["m1"], raw["v1"]), 0.0))
    y = pool(jnp.maximum(bn(conv(y, raw["w2"], raw["b2"]),
                            raw["g2"], raw["be2"], raw["m2"], raw["v2"]), 0.0))
    y = y.reshape(y.shape[0], -1)
    return jnp.dot(y, raw["wfc"].T, precision=HIGHEST) + raw["bfc"]


if __name__ == "__main__":
    key = jax.random.PRNGKey(0)
    k_params, k_x = jax.random.split(key)
    B, H = 16, 16                               # 2 grid steps of 8 images each
    x = jax.random.normal(k_x, (B, 1, H, H), jnp.float32)

    params, raw = init_params(k_params, num_classes=10, in_hw=H)

    out = convnet_forward(x, params, num_classes=10)
    out = jax.block_until_ready(out)
    assert out.shape == (B, 10) and out.dtype == jnp.float32

    ref = reference_forward(x, raw)
    # layer2 runs single-pass bf16 on the MXU (f32 accumulation); tolerance
    # absorbs that plus any reduced-precision passes of the on-MXU f32 dots.
    err = jnp.max(jnp.abs(out - ref))
    assert jnp.allclose(out, ref, atol=4e-2, rtol=4e-2), (
        f"mismatch: max abs err {err}")

    print("KERNEL_OK")
</pallas_src>

<mosaic_0001>
module attributes {stable_mosaic.version = 11 : i64} {
  func.func @_convnet_kernel(%arg0: i32, %arg1: memref<20x8x32xf32, #tpu.memory_space<vmem>>, %arg2: memref<5x32x256xf32, #tpu.memory_space<vmem>>, %arg3: memref<1x256xf32, #tpu.memory_space<vmem>>, %arg4: memref<1x256xf32, #tpu.memory_space<vmem>>, %arg5: memref<1280x256xbf16, #tpu.memory_space<vmem>>, %arg6: memref<1x256xf32, #tpu.memory_space<vmem>>, %arg7: memref<1x256xf32, #tpu.memory_space<vmem>>, %arg8: memref<1024x128xf32, #tpu.memory_space<vmem>>, %arg9: memref<1x128xf32, #tpu.memory_space<vmem>>, %arg10: memref<8x128xf32, #tpu.memory_space<vmem>>) attributes {dimension_semantics = [#tpu.dimension_semantics<parallel>], iteration_bounds = array<i64: 2>, scalar_prefetch = 0 : i64, scratch_operands = 0 : i64, tpu.core_type = #tpu.core_type<tc>, window_params = [{transform_indices = @transform_0, window_bounds = array<i64: 20, 8, 32>}, {pipeline_mode = #tpu.pipeline_mode<synchronous>, transform_indices = @transform_1, window_bounds = array<i64: 5, 32, 256>}, {pipeline_mode = #tpu.pipeline_mode<synchronous>, transform_indices = @transform_2, window_bounds = array<i64: 1, 256>}, {pipeline_mode = #tpu.pipeline_mode<synchronous>, transform_indices = @transform_3, window_bounds = array<i64: 1, 256>}, {pipeline_mode = #tpu.pipeline_mode<synchronous>, transform_indices = @transform_4, window_bounds = array<i64: 1280, 256>}, {pipeline_mode = #tpu.pipeline_mode<synchronous>, transform_indices = @transform_5, window_bounds = array<i64: 1, 256>}, {pipeline_mode = #tpu.pipeline_mode<synchronous>, transform_indices = @transform_6, window_bounds = array<i64: 1, 256>}, {pipeline_mode = #tpu.pipeline_mode<synchronous>, transform_indices = @transform_7, window_bounds = array<i64: 1024, 128>}, {pipeline_mode = #tpu.pipeline_mode<synchronous>, transform_indices = @transform_8, window_bounds = array<i64: 1, 128>}, {transform_indices = @transform_9, window_bounds = array<i64: 8, 128>}]} {
    %cst = arith.constant 0.000000e+00 : f32
    %0 = vector.broadcast %cst : f32 to vector<128x256xf32>
    %c0 = arith.constant 0 : index
    %c0_0 = arith.constant 0 : index
    %c0_1 = arith.constant 0 : index
    %1 = vector.load %arg1[%c0, %c0_0, %c0_1] : memref<20x8x32xf32, #tpu.memory_space<vmem>>, vector<16x8x32xf32>
    %2 = vector.shape_cast %1 : vector<16x8x32xf32> to vector<128x32xf32>
    %c0_2 = arith.constant 0 : index
    %c0_3 = arith.constant 0 : index
    %c0_4 = arith.constant 0 : index
    %3 = vector.load %arg2[%c0_2, %c0_3, %c0_4] : memref<5x32x256xf32, #tpu.memory_space<vmem>>, vector<1x32x256xf32>
    %4 = vector.shape_cast %3 : vector<1x32x256xf32> to vector<32x256xf32>
    %cst_5 = arith.constant dense<0.000000e+00> : vector<128x256xf32>
    %5 = tpu.matmul %2, %4, %cst_5 {dimension_numbers = #tpu.dot_dimension_numbers<[1], [0], [0], [1], [0, 0, 1, 1], [], []>} : vector<128x32xf32>, vector<32x256xf32>, vector<128x256xf32> -> vector<128x256xf32>
    %6 = arith.addf %0, %5 : vector<128x256xf32>
    %c1 = arith.constant 1 : index
    %c0_6 = arith.constant 0 : index
    %c0_7 = arith.constant 0 : index
    %7 = vector.load %arg1[%c1, %c0_6, %c0_7] : memref<20x8x32xf32, #tpu.memory_space<vmem>>, vector<16x8x32xf32>
    %8 = vector.shape_cast %7 : vector<16x8x32xf32> to vector<128x32xf32>
    %c1_8 = arith.constant 1 : index
    %c0_9 = arith.constant 0 : index
    %c0_10 = arith.constant 0 : index
    %9 = vector.load %arg2[%c1_8, %c0_9, %c0_10] : memref<5x32x256xf32, #tpu.memory_space<vmem>>, vector<1x32x256xf32>
    %10 = vector.shape_cast %9 : vector<1x32x256xf32> to vector<32x256xf32>
    %cst_11 = arith.constant dense<0.000000e+00> : vector<128x256xf32>
    %11 = tpu.matmul %8, %10, %cst_11 {dimension_numbers = #tpu.dot_dimension_numbers<[1], [0], [0], [1], [0, 0, 1, 1], [], []>} : vector<128x32xf32>, vector<32x256xf32>, vector<128x256xf32> -> vector<128x256xf32>
    %12 = arith.addf %6, %11 : vector<128x256xf32>
    %c2 = arith.constant 2 : index
    %c0_12 = arith.constant 0 : index
    %c0_13 = arith.constant 0 : index
    %13 = vector.load %arg1[%c2, %c0_12, %c0_13] : memref<20x8x32xf32, #tpu.memory_space<vmem>>, vector<16x8x32xf32>
    %14 = vector.shape_cast %13 : vector<16x8x32xf32> to vector<128x32xf32>
    %c2_14 = arith.constant 2 : index
    %c0_15 = arith.constant 0 : index
    %c0_16 = arith.constant 0 : index
    %15 = vector.load %arg2[%c2_14, %c0_15, %c0_16] : memref<5x32x256xf32, #tpu.memory_space<vmem>>, vector<1x32x256xf32>
    %16 = vector.shape_cast %15 : vector<1x32x256xf32> to vector<32x256xf32>
    %cst_17 = arith.constant dense<0.000000e+00> : vector<128x256xf32>
    %17 = tpu.matmul %14, %16, %cst_17 {dimension_numbers = #tpu.dot_dimension_numbers<[1], [0], [0], [1], [0, 0, 1, 1], [], []>} : vector<128x32xf32>, vector<32x256xf32>, vector<128x256xf32> -> vector<128x256xf32>
    %18 = arith.addf %12, %17 : vector<128x256xf32>
    %c3 = arith.constant 3 : index
    %c0_18 = arith.constant 0 : index
    %c0_19 = arith.constant 0 : index
    %19 = vector.load %arg1[%c3, %c0_18, %c0_19] : memref<20x8x32xf32, #tpu.memory_space<vmem>>, vector<16x8x32xf32>
    %20 = vector.shape_cast %19 : vector<16x8x32xf32> to vector<128x32xf32>
    %c3_20 = arith.constant 3 : index
    %c0_21 = arith.constant 0 : index
    %c0_22 = arith.constant 0 : index
    %21 = vector.load %arg2[%c3_20, %c0_21, %c0_22] : memref<5x32x256xf32, #tpu.memory_space<vmem>>, vector<1x32x256xf32>
    %22 = vector.shape_cast %21 : vector<1x32x256xf32> to vector<32x256xf32>
    %cst_23 = arith.constant dense<0.000000e+00> : vector<128x256xf32>
    %23 = tpu.matmul %20, %22, %cst_23 {dimension_numbers = #tpu.dot_dimension_numbers<[1], [0], [0], [1], [0, 0, 1, 1], [], []>} : vector<128x32xf32>, vector<32x256xf32>, vector<128x256xf32> -> vector<128x256xf32>
    %24 = arith.addf %18, %23 : vector<128x256xf32>
    %c4 = arith.constant 4 : index
    %c0_24 = arith.constant 0 : index
    %c0_25 = arith.constant 0 : index
    %25 = vector.load %arg1[%c4, %c0_24, %c0_25] : memref<20x8x32xf32, #tpu.memory_space<vmem>>, vector<16x8x32xf32>
    %26 = vector.shape_cast %25 : vector<16x8x32xf32> to vector<128x32xf32>
    %c4_26 = arith.constant 4 : index
    %c0_27 = arith.constant 0 : index
    %c0_28 = arith.constant 0 : index
    %27 = vector.load %arg2[%c4_26, %c0_27, %c0_28] : memref<5x32x256xf32, #tpu.memory_space<vmem>>, vector<1x32x256xf32>
    %28 = vector.shape_cast %27 : vector<1x32x256xf32> to vector<32x256xf32>
    %cst_29 = arith.constant dense<0.000000e+00> : vector<128x256xf32>
    %29 = tpu.matmul %26, %28, %cst_29 {dimension_numbers = #tpu.dot_dimension_numbers<[1], [0], [0], [1], [0, 0, 1, 1], [], []>} : vector<128x32xf32>, vector<32x256xf32>, vector<128x256xf32> -> vector<128x256xf32>
    %30 = arith.addf %24, %29 : vector<128x256xf32>
    %c0_30 = arith.constant 0 : index
    %c0_31 = arith.constant 0 : index
    %31 = vector.load %arg3[%c0_30, %c0_31] : memref<1x256xf32, #tpu.memory_space<vmem>>, vector<1x256xf32>
    %32 = vector.broadcast %31 : vector<1x256xf32> to vector<128x256xf32>
    %33 = arith.mulf %30, %32 : vector<128x256xf32>
    %c0_32 = arith.constant 0 : index
    %c0_33 = arith.constant 0 : index
    %34 = vector.load %arg4[%c0_32, %c0_33] : memref<1x256xf32, #tpu.memory_space<vmem>>, vector<1x256xf32>
    %35 = vector.broadcast %34 : vector<1x256xf32> to vector<128x256xf32>
    %36 = arith.addf %33, %35 : vector<128x256xf32>
    %cst_34 = arith.constant 0.000000e+00 : f32
    %37 = vector.broadcast %cst_34 : f32 to vector<128x256xf32>
    %38 = arith.maximumf %36, %37 : vector<128x256xf32>
    %39 = vector.shape_cast %38 : vector<128x256xf32> to vector<8x2x8x256xf32>
    %40 = vector.extract_strided_slice %39 {offsets = [0, 0, 0, 0], sizes = [8, 1, 8, 256], strides = [1, 1, 1, 1]} : vector<8x2x8x256xf32> to vector<8x1x8x256xf32>
    %41 = vector.shape_cast %40 : vector<8x1x8x256xf32> to vector<8x8x256xf32>
    %42 = vector.extract_strided_slice %39 {offsets = [0, 1, 0, 0], sizes = [8, 1, 8, 256], strides = [1, 1, 1, 1]} : vector<8x2x8x256xf32> to vector<8x1x8x256xf32>
    %43 = vector.shape_cast %42 : vector<8x1x8x256xf32> to vector<8x8x256xf32>
    %44 = arith.maximumf %41, %43 : vector<8x8x256xf32>
    %45 = vector.extract_strided_slice %44 {offsets = [0, 0, 16], sizes = [8, 8, 240], strides = [1, 1, 1]} : vector<8x8x256xf32> to vector<8x8x240xf32>
    %46 = vector.extract_strided_slice %44 {offsets = [0, 0, 0], sizes = [8, 8, 16], strides = [1, 1, 1]} : vector<8x8x256xf32> to vector<8x8x16xf32>
    %47 = tpu.concatenate %45, %46 in 2 : vector<8x8x240xf32>, vector<8x8x16xf32> -> vector<8x8x256xf32>
    %48 = arith.maximumf %44, %47 : vector<8x8x256xf32>
    %cst_35 = arith.constant 0.000000e+00 : f32
    %49 = vector.broadcast %cst_35 : f32 to vector<2x8x256xf32>
    %50 = tpu.concatenate %49, %48, %49 in 0 : vector<2x8x256xf32>, vector<8x8x256xf32>, vector<2x8x256xf32> -> vector<12x8x256xf32>
    %51 = vector.extract_strided_slice %50 {offsets = [0, 0, 0], sizes = [8, 8, 256], strides = [1, 1, 1]} : vector<12x8x256xf32> to vector<8x8x256xf32>
    %52 = vector.shape_cast %51 : vector<8x8x256xf32> to vector<64x256xf32>
    %53 = vector.extract_strided_slice %50 {offsets = [1, 0, 0], sizes = [8, 8, 256], strides = [1, 1, 1]} : vector<12x8x256xf32> to vector<8x8x256xf32>
    %54 = vector.shape_cast %53 : vector<8x8x256xf32> to vector<64x256xf32>
    %55 = vector.extract_strided_slice %50 {offsets = [2, 0, 0], sizes = [8, 8, 256], strides = [1, 1, 1]} : vector<12x8x256xf32> to vector<8x8x256xf32>
    %56 = vector.shape_cast %55 : vector<8x8x256xf32> to vector<64x256xf32>
    %57 = vector.extract_strided_slice %50 {offsets = [3, 0, 0], sizes = [8, 8, 256], strides = [1, 1, 1]} : vector<12x8x256xf32> to vector<8x8x256xf32>
    %58 = vector.shape_cast %57 : vector<8x8x256xf32> to vector<64x256xf32>
    %59 = vector.extract_strided_slice %50 {offsets = [4, 0, 0], sizes = [8, 8, 256], strides = [1, 1, 1]} : vector<12x8x256xf32> to vector<8x8x256xf32>
    %60 = vector.shape_cast %59 : vector<8x8x256xf32> to vector<64x256xf32>
    %61 = tpu.concatenate %52, %54, %56, %58, %60 in 1 : vector<64x256xf32>, vector<64x256xf32>, vector<64x256xf32>, vector<64x256xf32>, vector<64x256xf32> -> vector<64x1280xf32>
    %62 = arith.truncf %61 : vector<64x1280xf32> to vector<64x1280xbf16>
    %c0_36 = arith.constant 0 : index
    %c0_37 = arith.constant 0 : index
    %63 = vector.load %arg5[%c0_36, %c0_37] : memref<1280x256xbf16, #tpu.memory_space<vmem>>, vector<1280x256xbf16>
    %cst_38 = arith.constant dense<0.000000e+00> : vector<64x256xf32>
    %64 = tpu.matmul %62, %63, %cst_38 {dimension_numbers = #tpu.dot_dimension_numbers<[1], [0], [0], [1], [0, 0, 1, 1], [], []>} : vector<64x1280xbf16>, vector<1280x256xbf16>, vector<64x256xf32> -> vector<64x256xf32>
    %c0_39 = arith.constant 0 : index
    %c0_40 = arith.constant 0 : index
    %65 = vector.load %arg6[%c0_39, %c0_40] : memref<1x256xf32, #tpu.memory_space<vmem>>, vector<1x256xf32>
    %66 = vector.broadcast %65 : vector<1x256xf32> to vector<64x256xf32>
    %67 = arith.mulf %64, %66 : vector<64x256xf32>
    %c0_41 = arith.constant 0 : index
    %c0_42 = arith.constant 0 : index
    %68 = vector.load %arg7[%c0_41, %c0_42] : memref<1x256xf32, #tpu.memory_space<vmem>>, vector<1x256xf32>
    %69 = vector.broadcast %68 : vector<1x256xf32> to vector<64x256xf32>
    %70 = arith.addf %67, %69 : vector<64x256xf32>
    %cst_43 = arith.constant 0.000000e+00 : f32
    %71 = vector.broadcast %cst_43 : f32 to vector<64x256xf32>
    %72 = arith.maximumf %70, %71 : vector<64x256xf32>
    %73 = vector.shape_cast %72 : vector<64x256xf32> to vector<4x2x8x256xf32>
    %74 = vector.extract_strided_slice %73 {offsets = [0, 0, 0, 0], sizes = [4, 1, 8, 256], strides = [1, 1, 1, 1]} : vector<4x2x8x256xf32> to vector<4x1x8x256xf32>
    %75 = vector.shape_cast %74 : vector<4x1x8x256xf32> to vector<4x8x256xf32>
    %76 = vector.extract_strided_slice %73 {offsets = [0, 1, 0, 0], sizes = [4, 1, 8, 256], strides = [1, 1, 1, 1]} : vector<4x2x8x256xf32> to vector<4x1x8x256xf32>
    %77 = vector.shape_cast %76 : vector<4x1x8x256xf32> to vector<4x8x256xf32>
    %78 = arith.maximumf %75, %77 : vector<4x8x256xf32>
    %79 = vector.extract_strided_slice %78 {offsets = [0, 0, 32], sizes = [4, 8, 224], strides = [1, 1, 1]} : vector<4x8x256xf32> to vector<4x8x224xf32>
    %80 = vector.extract_strided_slice %78 {offsets = [0, 0, 0], sizes = [4, 8, 32], strides = [1, 1, 1]} : vector<4x8x256xf32> to vector<4x8x32xf32>
    %81 = tpu.concatenate %79, %80 in 2 : vector<4x8x224xf32>, vector<4x8x32xf32> -> vector<4x8x256xf32>
    %82 = arith.maximumf %78, %81 : vector<4x8x256xf32>
    %83 = vector.extract_strided_slice %82 {offsets = [0, 0, 0], sizes = [1, 8, 256], strides = [1, 1, 1]} : vector<4x8x256xf32> to vector<1x8x256xf32>
    %84 = vector.shape_cast %83 : vector<1x8x256xf32> to vector<8x256xf32>
    %85 = vector.extract_strided_slice %82 {offsets = [1, 0, 0], sizes = [1, 8, 256], strides = [1, 1, 1]} : vector<4x8x256xf32> to vector<1x8x256xf32>
    %86 = vector.shape_cast %85 : vector<1x8x256xf32> to vector<8x256xf32>
    %87 = vector.extract_strided_slice %82 {offsets = [2, 0, 0], sizes = [1, 8, 256], strides = [1, 1, 1]} : vector<4x8x256xf32> to vector<1x8x256xf32>
    %88 = vector.shape_cast %87 : vector<1x8x256xf32> to vector<8x256xf32>
    %89 = vector.extract_strided_slice %82 {offsets = [3, 0, 0], sizes = [1, 8, 256], strides = [1, 1, 1]} : vector<4x8x256xf32> to vector<1x8x256xf32>
    %90 = vector.shape_cast %89 : vector<1x8x256xf32> to vector<8x256xf32>
    %91 = tpu.concatenate %84, %86, %88, %90 in 1 : vector<8x256xf32>, vector<8x256xf32>, vector<8x256xf32>, vector<8x256xf32> -> vector<8x1024xf32>
    %c0_44 = arith.constant 0 : index
    %c0_45 = arith.constant 0 : index
    %92 = vector.load %arg8[%c0_44, %c0_45] : memref<1024x128xf32, #tpu.memory_space<vmem>>, vector<1024x128xf32>
    %cst_46 = arith.constant dense<0.000000e+00> : vector<8x128xf32>
    %93 = tpu.matmul %91, %92, %cst_46 {dimension_numbers = #tpu.dot_dimension_numbers<[1], [0], [0], [1], [0, 0, 1, 1], [], []>} : vector<8x1024xf32>, vector<1024x128xf32>, vector<8x128xf32> -> vector<8x128xf32>
    %c0_47 = arith.constant 0 : index
    %c0_48 = arith.constant 0 : index
    %94 = vector.load %arg9[%c0_47, %c0_48] : memref<1x128xf32, #tpu.memory_space<vmem>>, vector<1x128xf32>
    %95 = vector.broadcast %94 : vector<1x128xf32> to vector<8x128xf32>
    %96 = arith.addf %93, %95 : vector<8x128xf32>
    %c0_49 = arith.constant 0 : index
    %c0_50 = arith.constant 0 : index
    %97 = vector.load %arg10[%c0_49, %c0_50] : memref<8x128xf32, #tpu.memory_space<vmem>>, vector<8x128xf32>
    tpu.vector_store %arg10[%c0_49, %c0_50], %96 {strides = array<i32>} : memref<8x128xf32, #tpu.memory_space<vmem>>, vector<8x128xf32>,
    return
  }
  func.func @transform_0(%arg0: i32) -> (i32, i32, i32) {
    %c0_i32 = arith.constant 0 : i32
    %c0_i32_0 = arith.constant 0 : i32
    %c0_i32_1 = arith.constant 0 : i32
    return %c0_i32, %arg0, %c0_i32_0 : i32, i32, i32
  }
  func.func @transform_1(%arg0: i32) -> (i32, i32, i32) {
    %c0_i32 = arith.constant 0 : i32
    %c0_i32_0 = arith.constant 0 : i32
    %c0_i32_1 = arith.constant 0 : i32
    %c0_i32_2 = arith.constant 0 : i32
    return %c0_i32, %c0_i32_0, %c0_i32_1 : i32, i32, i32
  }
  func.func @transform_2(%arg0: i32) -> (i32, i32) {
    %c0_i32 = arith.constant 0 : i32
    %c0_i32_0 = arith.constant 0 : i32
    %c0_i32_1 = arith.constant 0 : i32
    return %c0_i32, %c0_i32_0 : i32, i32
  }
  func.func @transform_3(%arg0: i32) -> (i32, i32) {
    %c0_i32 = arith.constant 0 : i32
    %c0_i32_0 = arith.constant 0 : i32
    %c0_i32_1 = arith.constant 0 : i32
    return %c0_i32, %c0_i32_0 : i32, i32
  }
  func.func @transform_4(%arg0: i32) -> (i32, i32) {
    %c0_i32 = arith.constant 0 : i32
    %c0_i32_0 = arith.constant 0 : i32
    %c0_i32_1 = arith.constant 0 : i32
    return %c0_i32, %c0_i32_0 : i32, i32
  }
  func.func @transform_5(%arg0: i32) -> (i32, i32) {
    %c0_i32 = arith.constant 0 : i32
    %c0_i32_0 = arith.constant 0 : i32
    %c0_i32_1 = arith.constant 0 : i32
    return %c0_i32, %c0_i32_0 : i32, i32
  }
  func.func @transform_6(%arg0: i32) -> (i32, i32) {
    %c0_i32 = arith.constant 0 : i32
    %c0_i32_0 = arith.constant 0 : i32
    %c0_i32_1 = arith.constant 0 : i32
    return %c0_i32, %c0_i32_0 : i32, i32
  }
  func.func @transform_7(%arg0: i32) -> (i32, i32) {
    %c0_i32 = arith.constant 0 : i32
    %c0_i32_0 = arith.constant 0 : i32
    %c0_i32_1 = arith.constant 0 : i32
    return %c0_i32, %c0_i32_0 : i32, i32
  }
  func.func @transform_8(%arg0: i32) -> (i32, i32) {
    %c0_i32 = arith.constant 0 : i32
    %c0_i32_0 = arith.constant 0 : i32
    %c0_i32_1 = arith.constant 0 : i32
    return %c0_i32, %c0_i32_0 : i32, i32
  }
  func.func @transform_9(%arg0: i32) -> (i32, i32) {
    %c0_i32 = arith.constant 0 : i32
    %c0_i32_0 = arith.constant 0 : i32
    return %arg0, %c0_i32 : i32, i32
  }
}

</mosaic_0001>

<bundles_post_ra>
// kernel: convnet_forward.1
= control target key start
LH: loop header
LB: loop body
LE: loop exit
PB: predicated region body
PF: predicated region fallthrough
CT: control target
= control target key end

     0   :  { %14 = vsyncpa [#allocation4], 0  ;;  %s6629_s0 = inlined_call_operand.vmem [shape: f32[20,16,32], index: 0, kind: input, shape index: {}]   ;;  %s6630_s1 = inlined_call_operand.hbm [shape: f32[5,32,256], index: 1, kind: input, shape index: {}]   ;;  %s6631_s2 = inlined_call_operand.vmem [shape: f32[1,256], index: 2, kind: input, shape index: {}]   ;;  %s6632_s3 = inlined_call_operand.vmem [shape: f32[1,256], index: 3, kind: input, shape index: {}]   ;;  %s6633_s4 = inlined_call_operand.hbm [shape: bf16[1280,256], index: 4, kind: input, shape index: {}]   ;;  %s6634_s5 = inlined_call_operand.vmem [shape: f32[1,256], index: 5, kind: input, shape index: {}]   ;;  %s6635_s6 = inlined_call_operand.vmem [shape: f32[1,256], index: 6, kind: input, shape index: {}]   ;;  %s6636_s7 = inlined_call_operand.vmem [shape: f32[1024,128], index: 7, kind: input, shape index: {}]   ;;  %s6637_s8 = inlined_call_operand.vmem [shape: f32[1,128], index: 8, kind: input, shape index: {}]   ;;  %s6638_s9 = inlined_call_operand.hbm [shape: f32[16,128], index: 9, kind: output, shape index: {}]  }
   0x1   :  { %15 = vsyncpa [#allocation7], 0 }
   0x2   :  { %16 = vsyncpa [#allocation5], 0 }
   0x3   :  { %18 = vsyncpa [#allocation5 + $0x1], 0  ;;  %s5354_s30 = smov 0   ;;  %s5356_s10 = smov 0  }
   0x4   :  { %s5358_s11 = smov 0   ;;  %s5360_s12 = smov 0  }
   0x5 LB: > { %6646 = sst [smem:[#allocation12_spill]] %s5279_s30  ;;  %s5375_s13 = sadd.s32 4294967295, %s5291_s12   ;;  %s5291_s12 = sphi %s5360_s12, %s6665_s12   ;;  %s5287_s11 = sphi %s5358_s11, %s6669_s11   ;;  %s5283_s10 = sphi %s5356_s10, %s6668_s10   ;;  %s5279_s30 = sphi %s5354_s30, %s6667_s30  }
   0x6   : > { %s3976_s14 = sadd.s32 4294967294, %s5291_s12   ;;  %s5379_s15 = sadd.s32 1, %s5291_s12  }
   0x7   : > { %6647 = sst [smem:[#allocation13_spill]] %s5379_s15  ;;  %s31_s16 = sadd.s32 1, %s5287_s11 }
   0x8   : > { %s28_s17 = ssub.s32 %s5291_s12, %s5379_s15  ;;  %p38_p0 = scmp.ne.s32.totalorder %s5287_s11, %s5283_s10 }
   0x9   : > { %p29_p1 = scmp.eq.s32.totalorder %s28_s17, 0  ;;  %p39_p2 = scmp.eq.s32.totalorder %s5291_s12, 0 }
   0xa   : > { %p236_p3 = scmp.eq.s32.totalorder %s5375_s13, 1  ;;  %p241_p4 = scmp.ne.s32.totalorder %s5283_s10, %s5279_s30 }
   0xb   : > { %s5391_s18 = scalar_select %p29_p1, %s5287_s11, %s31_s16  }
   0xc   : > { %p5393_p5 = por %p39_p2, %p38_p0  ;;  %p5397_p6 = por %p236_p3, %p38_p0 }
   0xd   : > { %6648 = sst [smem:[#allocation14_spill]] %s5391_s18  ;;  %p242_p7 = scmp.eq.s32.totalorder %s3976_s14, 1 }
   0xe   : > { %s6649_s19 = scalar_select %p5393_p5, 1, 0 }
   0xf   : > { %s6650_s20 = scalar_select %p5397_p6, 1, 0 }
  0x10   : > { %p3977_p8 = scmp.ge.s32.totalorder %s5291_s12, 1  ;;  %p249_p9 = scmp.lt.s32.totalorder %s5291_s12, 3 }
  0x11   : > { %p5403_p10 = por %p242_p7, %p241_p4  ;;  %p6639_p11 = scmp.eq.s32.totalorder %s5375_s13, 0 }
  0x12   : > { %p5408_p12 = pnand %p3977_p8, %p249_p9  ;;  %s5293_s23 = smov [#allocation3]  }
  0x13   : > { %s6651_s21 = scalar_select %p5403_p10, 1, 0 }
  0x14   : > { %s6653_s22 = scalar_select %p5408_p12, 1, 0 }
  0x15   : > { %6652 = sst [smem:[#allocation15_spill]] %s6651_s21  ;;  %s261_s24 = sshll.u32 %s5293_s23, 4  ;;  %s262_s24 = int_to_ptr.vmem [resolvable:$true] %s261_s24 }
  0x16   : > { %p4807_p13 = pneg %p5408_p12  ;;  %s5294_s26 = smov [#allocation6]  }
  0x17   : > { %s280_s27 = sshll.u32 %s5294_s26, 4  ;;  %s5165_s14 = scalar_lea.hbm %s6630_s1, 5120  ;;  %s5420_s27 = int_to_ptr.vmem [resolvable:$true] %s280_s27 }
  0x18   : > { %p5416_p0 = pnand %p6639_p11, %p4807_p13  ;;  %p5166_p1 = scmp.ne.s32.totalorder %s6630_s1, %s5165_s14 }
  0x19   : > { %p5172_p7 = scmp.lt.u32.totalorder %s5165_s14, %s6630_s1 }
  0x1a   : > { %p5167_p2 = pneg %p5416_p0 }
  0x1c   : > { %p5168_p3 = pnand %p5167_p2, %p5166_p1 }
  0x1e   : > { %p5169_p4 = pneg %p5168_p3 }
  0x20   : > { %p5174_p8 = pnand %p5172_p7, %p5169_p4 }
  0x22   : > { %5177 = shalt.err (!%p5174_p8)
}
  0x23   : > { %s5178_s26 = scalar_lea.vmem %s262_s24, 5120  ;;  %p5186_p10 = scmp.lt.s32.totalorder %s262_s24, %s262_s24 }
  0x24   : > { %p5179_p9 = scmp.ne.s32.totalorder %s262_s24, %s5178_s26  ;;  %p5187_p6 = scmp.lt.s32.totalorder %s5178_s26, %s5178_s26 }
  0x26   : > { %p5181_p13 = pnand %p5179_p9, %p5167_p2  ;;  %p5188_p12 = por %p5187_p6, %p5186_p10 }
  0x28   : > { %p5182_p11 = pneg %p5181_p13 }
  0x2a   : > { %p5189_p5 = pnand %p5188_p12, %p5182_p11 }
  0x2c   : > { %5192 = shalt.err (!%p5189_p5)
}
  0x2d   : > { %s5295_s28 = smov 256   ;;  %s5296_s29 = smov 16  }
  0x2e   : > { %4810 = dma.hbm_to_vmem [thread:$0]  (!%p5416_p0), %s6630_s1, 5120, %s262_s24, [#allocation4], %s5295_s28, %s5295_s28, %s5296_s29  }
  0x2f   : > { %s5193_s23 = scalar_lea.hbm %s6633_s4, 20480 }
  0x30   : > { %p5194_p1 = scmp.ne.s32.totalorder %s6633_s4, %s5193_s23  ;;  %p5200_p10 = scmp.lt.u32.totalorder %s5193_s23, %s6633_s4 }
  0x32   : > { %p5196_p5 = pnand %p5194_p1, %p5167_p2 }
  0x34   : > { %p5197_p6 = pneg %p5196_p5 }
  0x36   : > { %p5202_p11 = pnand %p5200_p10, %p5197_p6 }
  0x38   : > { %5205 = shalt.err (!%p5202_p11)
}
  0x39   : > { %s5206_s24 = scalar_lea.vmem %s5420_s27, 20480  ;;  %p5214_p7 = scmp.lt.s32.totalorder %s5420_s27, %s5420_s27 }
  0x3a   : > { %p5207_p12 = scmp.ne.s32.totalorder %s5420_s27, %s5206_s24  ;;  %p5215_p8 = scmp.lt.s32.totalorder %s5206_s24, %s5206_s24 }
  0x3c   : > { %p5209_p3 = pnand %p5207_p12, %p5167_p2  ;;  %p5216_p9 = por %p5215_p8, %p5214_p7 }
  0x3e   : > { %p5210_p4 = pneg %p5209_p3 }
  0x40   : > { %p5217_p13 = pnand %p5216_p9, %p5210_p4 }
  0x42   : > { %5220 = shalt.err (!%p5217_p13)
}
  0x43   : > { %s5297_s30 = smov 128   ;;  %s5298_s15 = smov 8  }
  0x44   : > { %4813 = dma.hbm_to_vmem [thread:$0]  (!%p5416_p0), %s6633_s4, 20480, %s5420_s27, [#allocation7], %s5297_s30, %s5297_s30, %s5298_s15  }
  0x45   : > { %p3980_p1 = scmp.ge.s32.totalorder %s5291_s12, 2 }
  0x46   : > { %p6655_p2 = scmp.ne.s32.totalorder (!%p3980_p1), %s6649_s19, 0 }
  0x47   : > { %302 = sbr.rel (%p3980_p1) target bundleno = 92 (0x5c), region = 48 }
  0x4e   : > { %305 = sbr.rel (!%p6655_p2) target bundleno = 92 (0x5c), region = 52  ;;  %s307_s29 = sand.u32 (%p6655_p2), 1, %s5287_s11  }
  0x4f   : > { %s3981_s18 = sshll.u32 (%p6655_p2), %s5291_s12, 3  ;;  %s4795_s14 = smul.u32 (%p6655_p2), 160, %s307_s29 }
  0x50   : > { %s5479_s25 = scalar_lea.vmem (%p6655_p2), %s6629_s0, %s3981_s18 }
  0x51   : > { %v377_v0 = vld [vmem:[%s5479_s25] sm:$0xff] (%p6655_p2)  ;;  %v379_v1 = vld [vmem:[%s5479_s25 + $0x10] sm:$0xff] (%p6655_p2)  ;;  %s5487_s19 = scalar_lea.vmem (%p6655_p2), [#allocation2], %s4795_s14 }
  0x52   : > { %v381_v2 = vld [vmem:[%s5479_s25 + $0x20] sm:$0xff] (%p6655_p2)  ;;  %v383_v3 = vld [vmem:[%s5479_s25 + $0x30] sm:$0xff] (%p6655_p2)  ;;  %378 = vst [vmem:[%s5487_s19] sm:$0xff] (%p6655_p2), %v377_v0  ;;  %380 = vst [vmem:[%s5487_s19 + $0x8] sm:$0xff] (%p6655_p2), %v379_v1 }
  0x53   : > { %v385_v4 = vld [vmem:[%s5479_s25 + $0x40] sm:$0xff] (%p6655_p2)  ;;  %v387_v5 = vld [vmem:[%s5479_s25 + $0x50] sm:$0xff] (%p6655_p2)  ;;  %382 = vst [vmem:[%s5487_s19 + $0x10] sm:$0xff] (%p6655_p2), %v381_v2  ;;  %384 = vst [vmem:[%s5487_s19 + $0x18] sm:$0xff] (%p6655_p2), %v383_v3 }
  0x54   : > { %386 = vst [vmem:[%s5487_s19 + $0x20] sm:$0xff] (%p6655_p2), %v385_v4  ;;  %388 = vst [vmem:[%s5487_s19 + $0x28] sm:$0xff] (%p6655_p2), %v387_v5  ;;  %v389_v6 = vld [vmem:[%s5479_s25 + $0x60] sm:$0xff] (%p6655_p2)  ;;  %v391_v7 = vld [vmem:[%s5479_s25 + $0x70] sm:$0xff] (%p6655_p2) }
  0x55   : > { %v393_v8 = vld [vmem:[%s5479_s25 + $0x80] sm:$0xff]  ;;  %390 = vst [vmem:[%s5487_s19 + $0x30] sm:$0xff] %v389_v6  ;;  %392 = vst [vmem:[%s5487_s19 + $0x38] sm:$0xff] %v391_v7  ;;  %v395_v9 = vld [vmem:[%s5479_s25 + $0x90] sm:$0xff] }
  0x56   : > { %394 = vst [vmem:[%s5487_s19 + $0x40] sm:$0xff] %v393_v8  ;;  %v397_v10 = vld [vmem:[%s5479_s25 + $0xa0] sm:$0xff]  ;;  %v399_v11 = vld [vmem:[%s5479_s25 + $0xb0] sm:$0xff]  ;;  %396 = vst [vmem:[%s5487_s19 + $0x48] sm:$0xff] %v395_v9 }
  0x57   : > { %398 = vst [vmem:[%s5487_s19 + $0x50] sm:$0xff] %v397_v10  ;;  %400 = vst [vmem:[%s5487_s19 + $0x58] sm:$0xff] %v399_v11  ;;  %v401_v12 = vld [vmem:[%s5479_s25 + $0xc0] sm:$0xff]  ;;  %v403_v13 = vld [vmem:[%s5479_s25 + $0xd0] sm:$0xff] }
  0x58   : > { %v405_v14 = vld [vmem:[%s5479_s25 + $0xe0] sm:$0xff]  ;;  %402 = vst [vmem:[%s5487_s19 + $0x60] sm:$0xff] %v401_v12  ;;  %404 = vst [vmem:[%s5487_s19 + $0x68] sm:$0xff] %v403_v13  ;;  %v407_v15 = vld [vmem:[%s5479_s25 + $0xf0] sm:$0xff] }
  0x59   : > { %406 = vst [vmem:[%s5487_s19 + $0x70] sm:$0xff] %v405_v14  ;;  %v409_v16 = vld [vmem:[%s5479_s25 + $0x100] sm:$0xff]  ;;  %v411_v17 = vld [vmem:[%s5479_s25 + $0x110] sm:$0xff]  ;;  %408 = vst [vmem:[%s5487_s19 + $0x78] sm:$0xff] %v407_v15 }
  0x5a   : > { %410 = vst [vmem:[%s5487_s19 + $0x80] sm:$0xff] %v409_v16  ;;  %412 = vst [vmem:[%s5487_s19 + $0x88] sm:$0xff] %v411_v17  ;;  %v413_v18 = vld [vmem:[%s5479_s25 + $0x120] sm:$0xff]  ;;  %v415_v19 = vld [vmem:[%s5479_s25 + $0x130] sm:$0xff] }
  0x5b   : > { %414 = vst [vmem:[%s5487_s19 + $0x90] sm:$0xff] %v413_v18  ;;  %416 = vst [vmem:[%s5487_s19 + $0x98] sm:$0xff] %v415_v19 }
  0x5c PF: > { %p6656_p0 = scmp.ne.s32.totalorder %s6653_s22, 0 }
  0x5d   : > { %s5526_s27 = sand.u32 (!%p6656_p0), 1, %s5283_s10   ;;  %p6657_p5 = scmp.eq.s32.totalorder (!%p6656_p0), %s5375_s13, 0 }
  0x5e   : > { %425 = sbr.rel (%p6656_p0) target bundleno = 1579 (0x62b), region = 90 }
  0x5f   : > { %s4796_s23 = smul.u32 (!%p6656_p0), 160, %s5526_s27 }
  0x61   : > { %s5529_s26 = scalar_lea.vmem (!%p6656_p0), [#allocation2], %s4796_s23 }
  0x65   : > { %5266 = dma.done.wait (%p6657_p5), [#allocation4], 5120   ;;  %p6658_p6 = pmov %p6657_p5 }
  0x66   : > { %p6659_p10 = pmov %p6657_p5 }
  0x67   : > { %5268 = vsyncadd (%p6658_p6), [#allocation4], 4294962176 }
  0x68   : > { %5270 = dma.done.wait (%p6659_p10), [#allocation7], 20480   ;;  %p6660_p11 = pmov %p6657_p5 }
  0x69   : > { %v5299_v20 = vmov 0.0   ;;  %v514_v21 = vld [vmem:[#allocation3 + $0x48] sm:$0xff]  ;;  %v516_v22 = vld [vmem:[#allocation3 + $0x58] sm:$0xff]  ;;  %v513_v23 = vld [vmem:[#allocation3 + $0x40] sm:$0xff]  ;;  %vm521_vm0 = vcmask 261120   ;;  %s5301_s21 = smov 112  }
  0x6a   : > { %5272 = vsyncadd (%p6660_p11), [#allocation7], 4294946816  ;;  %634 = vmatprep.mubr.f32.mxu0 %v5299_v20  ;;  %v4435_v24 = vpack.c.bf16 %v516_v22, %v514_v21  ;;  %v515_v25 = vld [vmem:[#allocation3 + $0x50] sm:$0xff]  ;;  %v518_v26 = vld [vmem:[#allocation3 + $0x68] sm:$0xff]  ;;  %vm1925_vm1 = vcmask 916480   ;;  %s5302_s17 = smov 96  }
  0x6b   : > { %v520_v27 = vld [vmem:[#allocation3 + $0x78] sm:$0xff]  ;;  %v4437_v28 = vpack.c.bf16 %v515_v25, %v513_v23  ;;  %v517_v30 = vld [vmem:[#allocation3 + $0x60] sm:$0xff]  ;;  %v519_v31 = vld [vmem:[#allocation3 + $0x70] sm:$0xff]  ;;  %vm3430_vm2 = vcmask 785408   ;;  %s3985_s23 = sshll.u32 %s5526_s27, 3  ;;  %s3876_s28 = scalar_lea.sflag [#allocation5], %s5526_s27 }
  0x6c   : > { %v4439_v29 = vpack.c.bf16 %v520_v27, %v518_v26  ;;  %4436 = vmatprep.subr.bf16.mxu0 %v4435_v24  ;;  %v488_v32 = vld [vmem:[#allocation3 + $0x8] sm:$0xff]  ;;  %v490_v33 = vld [vmem:[#allocation3 + $0x18] sm:$0xff]  ;;  %v4441_v34 = vpack.c.bf16 %v519_v31, %v517_v30  ;;  %v487_v36 = vld [vmem:[#allocation3] sm:$0xff]  ;;  %s470_s22 = scalar_lea.vmem [#allocation8], %s3985_s23  ;;  %p6661_p3 = scmp.ne.s32.totalorder %s6650_s20, 0 }
  0x6d   : > { %4438 = vmatpush1.bf16.msra.mxu0 %v4437_v28  ;;  %v4443_v35 = vpack.c.bf16 %v490_v33, %v488_v32  ;;  %v489_v37 = vld [vmem:[#allocation3 + $0x10] sm:$0xff]  ;;  %v492_v38 = vld [vmem:[#allocation3 + $0x28] sm:$0xff]  ;;  %v494_v39 = vld [vmem:[#allocation3 + $0x38] sm:$0xff]  ;;  %s3889_s24 = sshll.u32 %s470_s22, 4  ;;  %s6587_s24 = int_to_ptr.vmem [resolvable:$true] %s3889_s24 }
  0x6e   : > { %4440 = vmatprep.subr.bf16.mxu0 %v4439_v29  ;;  %v5541_v40 = vld [vmem:[%s5529_s26 + $0x8] sm:$0xff]  ;;  %v4445_v41 = vpack.c.bf16 %v489_v37, %v487_v36  ;;  %v4447_v42 = vpack.c.bf16 %v494_v39, %v492_v38  ;;  %v491_v43 = vld [vmem:[#allocation3 + $0x20] sm:$0xff]  ;;  %v493_v44 = vld [vmem:[#allocation3 + $0x30] sm:$0xff]  ;;  %s5221_s29 = scalar_lea.vmem %s6587_s24, 128 }
  0x6f   : > { %v959_v45 = vld [vmem:[#allocation3 + $0x88] sm:$0xff]  ;;  %v961_v46 = vld [vmem:[#allocation3 + $0x98] sm:$0xff]  ;;  %v5547_v47 = vld [vmem:[%s5529_s26 + $0x10] sm:$0xff]  ;;  %v4449_v48 = vpack.c.bf16 %v493_v44, %v491_v43  ;;  %p5222_p12 = scmp.ne.s32.totalorder %s6587_s24, %s5221_s29 }
  0x70   : > { %v4451_v49 = vpack.c.bf16 %v961_v46, %v959_v45  ;;  %v5550_v50 = vld [vmem:[%s5529_s26 + $0x18] sm:$0xff]  ;;  %v5556_v51 = vld [vmem:[%s5529_s26 + $0x20] sm:$0xff]  ;;  %v5562_v52 = vld [vmem:[%s5529_s26 + $0x28] sm:$0xff] }
  0x71   : > { %4442 = vmatpush1.bf16.msra.mxu0 %v4441_v34  ;;  %v5568_v53 = vld [vmem:[%s5529_s26 + $0x30] sm:$0xff]  ;;  %v5574_v54 = vld [vmem:[%s5529_s26 + $0x38] sm:$0xff]  ;;  %v5580_v55 = vld [vmem:[%s5529_s26 + $0x40] sm:$0xff]  ;;  %p5223_p4 = pnand %p5222_p12, %p6661_p3 }
  0x72   : > { %4444 = vmatprep.subr.bf16.mxu0 %v4443_v35  ;;  %v5586_v56 = vld [vmem:[%s5529_s26 + $0x48] sm:$0xff]  ;;  %v5595_v57 = vld [vmem:[%s5529_s26 + $0x50] sm:$0xff]  ;;  %v5598_v58 = vld [vmem:[%s5529_s26 + $0x58] sm:$0xff] }
  0x73   : > { %v5604_v59 = vld [vmem:[%s5529_s26 + $0x60] sm:$0xff]  ;;  %v5610_v60 = vld [vmem:[%s5529_s26 + $0x68] sm:$0xff]  ;;  %v5616_v61 = vld [vmem:[%s5529_s26 + $0x70] sm:$0xff]  ;;  %p5224_p7 = pneg %p5223_p4 }
  0x74   : > { %4002 = vmatmul.mubr.msk.f32.vlgmr.msra.gmra.mrb[0].mxu0 %vm521_vm0, %v5541_v40  ;;  %v5622_v62 = vld [vmem:[%s5529_s26 + $0x78] sm:$0xff]  ;;  %v5628_v63 = vld [vmem:[%s5529_s26 + $0x80] sm:$0xff]  ;;  %v960_v1 = vld [vmem:[#allocation3 + $0x90] sm:$0xff] }
  0x75   : > { %4446 = vmatpush1.bf16.msra.mxu0 %v4445_v41  ;;  %640 = vmatprep.mubr.f32.mxu0 %v5299_v20  ;;  %v958_v0 = vld [vmem:[#allocation3 + $0x80] sm:$0xff]  ;;  %v963_v2 = vld [vmem:[#allocation3 + $0xa8] sm:$0xff]  ;;  %v965_v3 = vld [vmem:[#allocation3 + $0xb8] sm:$0xff] }
  0x76   : > { %4448 = vmatprep.subr.bf16.mxu0 %v4447_v42  ;;  %v471_v4 = vld [vmem:[%s5529_s26] sm:$0xff]  ;;  %v4453_v5 = vpack.c.bf16 %v960_v1, %v958_v0  ;;  %v4455_v6 = vpack.c.bf16 %v965_v3, %v963_v2  ;;  %v964_v8 = vld [vmem:[#allocation3 + $0xb0] sm:$0xff]  ;;  %v1226_v9 = vld [vmem:[#allocation3 + $0xc8] sm:$0xff] }
  0x77   : > { %v962_v7 = vld [vmem:[#allocation3 + $0xa0] sm:$0xff]  ;;  %v1228_v10 = vld [vmem:[#allocation3 + $0xd8] sm:$0xff]  ;;  %v1227_v14 = vld [vmem:[#allocation3 + $0xd0] sm:$0xff] }
  0x78   : > { %4003 = vmatmul.mubr.msk.f32.gmra.mrb[2].mxu0 %vm521_vm0, %v5547_v47  ;;  %v4457_v11 = vpack.c.bf16 %v964_v8, %v962_v7  ;;  %v4459_v12 = vpack.c.bf16 %v1228_v10, %v1226_v9  ;;  %v1225_v13 = vld [vmem:[#allocation3 + $0xc0] sm:$0xff]  ;;  %v1230_v15 = vld [vmem:[#allocation3 + $0xe8] sm:$0xff]  ;;  %v1232_v16 = vld [vmem:[#allocation3 + $0xf8] sm:$0xff] }
  0x79   : > { %646 = vmatprep.mubr.f32.mxu0 %v5299_v20  ;;  %4450 = vmatpush1.bf16.msra.mxu0 %v4449_v48  ;;  %v4461_v17 = vpack.c.bf16 %v1227_v14, %v1225_v13  ;;  %v4463_v18 = vpack.c.bf16 %v1232_v16, %v1230_v15  ;;  %v1229_v19 = vld [vmem:[#allocation3 + $0xe0] sm:$0xff]  ;;  %v1231_v21 = vld [vmem:[#allocation3 + $0xf0] sm:$0xff]  ;;  %v1493_v22 = vld [vmem:[#allocation3 + $0x108] sm:$0xff] }
  0x7a   : > { %4452 = vmatprep.subr.bf16.mxu0 %v4451_v49  ;;  %v1495_v23 = vld [vmem:[#allocation3 + $0x118] sm:$0xff]  ;;  %v4465_v24 = vpack.c.bf16 %v1231_v21, %v1229_v19  ;;  %v5730_v26 = vld [vmem:[%s5529_s26 + $0x88] sm:$0xff]  ;;  %v1492_v27 = vld [vmem:[#allocation3 + $0x100] sm:$0xff] }
  0x7b   : > { %v4467_v25 = vpack.c.bf16 %v1495_v23, %v1493_v22  ;;  %v1494_v28 = vld [vmem:[#allocation3 + $0x110] sm:$0xff]  ;;  %v1497_v29 = vld [vmem:[#allocation3 + $0x128] sm:$0xff]  ;;  %v1499_v30 = vld [vmem:[#allocation3 + $0x138] sm:$0xff] }
  0x7c   : > { %4004 = vmatmul.mubr.msk.f32.gmra.mrb[4].mxu0 %vm521_vm0, %v5550_v50  ;;  %v4469_v31 = vpack.c.bf16 %v1494_v28, %v1492_v27  ;;  %v4471_v32 = vpack.c.bf16 %v1499_v30, %v1497_v29  ;;  %v1496_v33 = vld [vmem:[#allocation3 + $0x120] sm:$0xff]  ;;  %v1498_v34 = vld [vmem:[#allocation3 + $0x130] sm:$0xff]  ;;  %v4113_v37 = vld [vmem:[%s5529_s26 + $0x98] sm:$0xff] }
  0x7d   : > { %652 = vmatprep.mubr.f32.mxu0 %v5299_v20  ;;  %v4473_v35 = vpack.c.bf16 %v1498_v34, %v1496_v33  ;;  %v4081_v36 = vld [vmem:[%s5529_s26 + $0x90] sm:$0xff]  ;;  %v4925_v38 = vld [vmem:[#allocation6 + $0x4] ss:$8 sps:$4 sm:$0xff]   ;;  %v4927_v39 = vld [vmem:[#allocation6] ss:$8 sps:$4 sm:$0xff]   ;;  %s4292_s26 = sshll.u32 %s5375_s13, 7 }
  0x7e   : > { %2961 = vmatprep.subr.bf16.mxu1 %v4925_v38  ;;  %v4930_v41 = vld [vmem:[#allocation6 + $0x10] ss:$8 sps:$4 sm:$0xff]   ;;  %v4931_v42 = vld [vmem:[#allocation6 + $0x24] ss:$8 sps:$4 sm:$0xff]   ;;  %v4933_v43 = vld [vmem:[#allocation6 + $0x20] ss:$8 sps:$4 sm:$0xff]  }
  0x7f   : > { %2962 = vmatpush1.bf16.msra.mxu1 %v4927_v39  ;;  %v4934_v44 = vld [vmem:[#allocation6 + $0x34] ss:$8 sps:$4 sm:$0xff]   ;;  %v4936_v45 = vld [vmem:[#allocation6 + $0x30] ss:$8 sps:$4 sm:$0xff]   ;;  %v4937_v46 = vld [vmem:[#allocation6 + $0x44] ss:$8 sps:$4 sm:$0xff]  }
  0x80   : > { %4005 = vmatmul.mubr.msk.f32.gmra.mrb[6].mxu0 %vm521_vm0, %v5556_v51  ;;  %v4940_v48 = vld [vmem:[#allocation6 + $0x54] ss:$8 sps:$4 sm:$0xff]   ;;  %v4942_v49 = vld [vmem:[#allocation6 + $0x50] ss:$8 sps:$4 sm:$0xff]   ;;  %v4963_v0 = vld [vmem:[#allocation6 + $0xc0] ss:$8 sps:$4 sm:$0xff]  }
  0x81   : > { %658 = vmatprep.mubr.f32.mxu0 %v5299_v20  ;;  %v4964_v1 = vld [vmem:[#allocation6 + $0xd4] ss:$8 sps:$4 sm:$0xff]   ;;  %v4966_v2 = vld [vmem:[#allocation6 + $0xd0] ss:$8 sps:$4 sm:$0xff]   ;;  %v4967_v3 = vld [vmem:[#allocation6 + $0xe4] ss:$8 sps:$4 sm:$0xff]  }
  0x82   : > { %v4972_v7 = vld [vmem:[#allocation6 + $0xf0] ss:$8 sps:$4 sm:$0xff]   ;;  %v4975_v8 = vld [vmem:[#allocation6 + $0x104] ss:$8 sps:$4 sm:$0xff]   ;;  %v4973_v10 = vld [vmem:[#allocation6 + $0x100] ss:$8 sps:$4 sm:$0xff]  }
  0x83   : > { %v1741_v13 = vld [vmem:[%s6631_s2] sm:$0x3]  ;;  %v4976_v15 = vld [vmem:[#allocation6 + $0x110] ss:$8 sps:$4 sm:$0xff]   ;;  %v4981_v16 = vld [vmem:[#allocation6 + $0x124] ss:$8 sps:$4 sm:$0xff]  }
  0x84   : > { %4006 = vmatmul.mubr.msk.f32.gmra.mrb[8].mxu0 %vm521_vm0, %v5562_v52  ;;  %v4979_v21 = vld [vmem:[#allocation6 + $0x120] ss:$8 sps:$4 sm:$0xff]   ;;  %v4984_v29 = vld [vmem:[#allocation6 + $0x134] ss:$8 sps:$4 sm:$0xff]   ;;  %v4982_v33 = vld [vmem:[#allocation6 + $0x130] ss:$8 sps:$4 sm:$0xff]  }
  0x85   : > { %664 = vmatprep.mubr.f32.mxu0 %v5299_v20  ;;  %v4985_v38 = vld [vmem:[#allocation6 + $0x140] ss:$8 sps:$4 sm:$0xff]   ;;  %s5303_s13 = smov [#allocation8]  }
  0x86   : > { %s5225_s18 = sshll.u32 %s5303_s13, 4  ;;  %s5226_s18 = int_to_ptr.vmem [resolvable:$false] %s5225_s18 }
  0x87   : > { %s5227_s14 = scalar_lea.vmem %s5226_s18, 256  ;;  %p5228_p8 = scmp.lt.s32.totalorder %s6587_s24, %s5226_s18 }
  0x88   : > { %4007 = vmatmul.mubr.msk.f32.gmra.mrb[10].mxu0 %vm521_vm0, %v5568_v53  ;;  %p5229_p9 = scmp.lt.s32.totalorder %s5227_s14, %s5221_s29 }
  0x89   : > { %670 = vmatprep.mubr.f32.mxu0 %v5299_v20 }
  0x8a   : > { %p5230_p13 = por %p5229_p9, %p5228_p8 }
  0x8c   : > { %4008 = vmatmul.mubr.msk.f32.gmra.mrb[12].mxu0 %vm521_vm0, %v5574_v54  ;;  %p5231_p2 = pnand %p5230_p13, %p5224_p7 }
  0x8d   : > { %676 = vmatprep.mubr.f32.mxu0 %v5299_v20 }
  0x90   : > { %4009 = vmatmul.mubr.msk.f32.gmra.mrb[14].mxu0 %vm521_vm0, %v5580_v55 }
  0x91   : > { %682 = vmatprep.mubr.f32.mxu0 %v5299_v20 }
  0x94   : > { %4010 = vmatmul.mubr.msk.f32.gmra.mrb[16].mxu0 %vm521_vm0, %v5586_v56 }
  0x95   : > { %688 = vmatprep.mubr.f32.mxu0 %v5299_v20 }
  0x98   : > { %4011 = vmatmul.mubr.msk.f32.gmra.mrb[18].mxu0 %vm521_vm0, %v5595_v57 }
  0x99   : > { %694 = vmatprep.mubr.f32.mxu0 %v5299_v20 }
  0x9c   : > { %4012 = vmatmul.mubr.msk.f32.gmra.mrb[20].mxu0 %vm521_vm0, %v5598_v58 }
  0x9d   : > { %700 = vmatprep.mubr.f32.mxu0 %v5299_v20 }
  0xa0   : > { %4013 = vmatmul.mubr.msk.f32.gmra.mrb[22].mxu0 %vm521_vm0, %v5604_v59 }
  0xa1   : > { %706 = vmatprep.mubr.f32.mxu0 %v5299_v20 }
  0xa4   : > { %4014 = vmatmul.mubr.msk.f32.gmra.mrb[24].mxu0 %vm521_vm0, %v5610_v60 }
  0xa5   : > { %712 = vmatprep.mubr.f32.mxu0 %v5299_v20 }
  0xa8   : > { %4015 = vmatmul.mubr.msk.f32.gmra.mrb[26].mxu0 %vm521_vm0, %v5616_v61 }
  0xa9   : > { %718 = vmatprep.mubr.f32.mxu0 %v5299_v20 }
  0xac   : > { %4016 = vmatmul.mubr.msk.f32.gmra.mrb[28].mxu0 %vm521_vm0, %v5622_v62 }
  0xad   : > { %724 = vmatprep.mubr.f32.mxu0 %v5299_v20 }
  0xb0   : > { %4017 = vmatmul.mubr.msk.f32.gmra.mrb[30].mxu0 %vm521_vm0, %v5628_v63 }
  0xb1   : > { %843 = vmatprep.mubr.f32.mxu0 %v5299_v20 }
  0xb4   : > { %4018 = vmatmul.mubr.msk.f32.vlgmr.msra.gmra.mrb[0].mxu0 %vm521_vm0, %v471_v4  ;;  %v4969_v4 = vld [vmem:[#allocation6 + $0xe0] ss:$8 sps:$4 sm:$0xff]  }
  0xb5   : > { %4454 = vmatpush1.bf16.msra.mxu0 %v4453_v5  ;;  %849 = vmatprep.mubr.f32.mxu0 %v5299_v20  ;;  %v4970_v5 = vld [vmem:[#allocation6 + $0xf4] ss:$8 sps:$4 sm:$0xff]  }
  0xb6   : > { %4456 = vmatprep.subr.bf16.mxu0 %v4455_v6  ;;  %v1743_v6 = vlaneseq }
  0xb8   : > { %4019 = vmatmul.mubr.msk.f32.gmra.mrb[2].mxu0 %vm521_vm0, %v5541_v40  ;;  %v4928_v40 = vld [vmem:[#allocation6 + $0x14] ss:$8 sps:$4 sm:$0xff]   ;;  %v1744_v9 = vshrl.u32 %v1743_v6, 7 }
  0xb9   : > { %855 = vmatprep.mubr.f32.mxu0 %v5299_v20  ;;  %4458 = vmatpush1.bf16.msra.mxu0 %v4457_v11  ;;  %v4978_v11 = vld [vmem:[#allocation6 + $0x114] ss:$8 sps:$4 sm:$0xff]  }
  0xba   : > { %4460 = vmatprep.subr.bf16.mxu0 %v4459_v12  ;;  %2963 = vmatprep.subr.bf16.mxu1 %v4928_v40  ;;  %v5830_v12 = vsub.s32 0, %v1744_v9  ;;  %v5835_v14 = vsub.s32 1, %v1744_v9 }
  0xbb   : > { %2964 = vmatpush1.bf16.msra.mxu1 %v4930_v41 }
  0xbc   : > { %4020 = vmatmul.mubr.msk.f32.gmra.mrb[4].mxu0 %vm521_vm0, %v5547_v47  ;;  %2965 = vmatprep.subr.bf16.mxu1 %v4931_v42  ;;  %v5845_v19 = vrot.slane %v1741_v13, %v5835_v14 }
  0xbd   : > { %861 = vmatprep.mubr.f32.mxu0 %v5299_v20 }
  0xbf   : > { %2966 = vmatpush1.bf16.msra.mxu1 %v4933_v43 }
  0xc0   : > { %4021 = vmatmul.mubr.msk.f32.gmra.mrb[6].mxu0 %vm521_vm0, %v5550_v50  ;;  %2967 = vmatprep.subr.bf16.mxu1 %v4934_v44 }
  0xc1   : > { %867 = vmatprep.mubr.f32.mxu0 %v5299_v20 }
  0xc3   : > { %2968 = vmatpush1.bf16.msra.mxu1 %v4936_v45 }
  0xc4   : > { %4022 = vmatmul.mubr.msk.f32.gmra.mrb[8].mxu0 %vm521_vm0, %v5556_v51  ;;  %2969 = vmatprep.subr.bf16.mxu1 %v4937_v46 }
  0xc5   : > { %873 = vmatprep.mubr.f32.mxu0 %v5299_v20 }
  0xc8   : > { %4023 = vmatmul.mubr.msk.f32.gmra.mrb[10].mxu0 %vm521_vm0, %v5562_v52 }
  0xc9   : > { %879 = vmatprep.mubr.f32.mxu0 %v5299_v20 }
  0xcc   : > { %4024 = vmatmul.mubr.msk.f32.gmra.mrb[12].mxu0 %vm521_vm0, %v5568_v53 }
  0xcd   : > { %885 = vmatprep.mubr.f32.mxu0 %v5299_v20 }
  0xd0   : > { %4025 = vmatmul.mubr.msk.f32.gmra.mrb[14].mxu0 %vm521_vm0, %v5574_v54 }
  0xd1   : > { %891 = vmatprep.mubr.f32.mxu0 %v5299_v20 }
  0xd4   : > { %4026 = vmatmul.mubr.msk.f32.gmra.mrb[16].mxu0 %vm521_vm0, %v5580_v55 }
  0xd5   : > { %897 = vmatprep.mubr.f32.mxu0 %v5299_v20 }
  0xd8   : > { %4027 = vmatmul.mubr.msk.f32.gmra.mrb[18].mxu0 %vm521_vm0, %v5586_v56 }
  0xd9   : > { %903 = vmatprep.mubr.f32.mxu0 %v5299_v20 }
  0xdc   : > { %4028 = vmatmul.mubr.msk.f32.gmra.mrb[20].mxu0 %vm521_vm0, %v5595_v57 }
  0xdd   : > { %909 = vmatprep.mubr.f32.mxu0 %v5299_v20 }
  0xe0   : > { %4029 = vmatmul.mubr.msk.f32.gmra.mrb[22].mxu0 %vm521_vm0, %v5598_v58 }
  0xe1   : > { %915 = vmatprep.mubr.f32.mxu0 %v5299_v20 }
  0xe4   : > { %4030 = vmatmul.mubr.msk.f32.gmra.mrb[24].mxu0 %vm521_vm0, %v5604_v59 }
  0xe5   : > { %921 = vmatprep.mubr.f32.mxu0 %v5299_v20 }
  0xe8   : > { %4031 = vmatmul.mubr.msk.f32.gmra.mrb[26].mxu0 %vm521_vm0, %v5610_v60 }
  0xe9   : > { %927 = vmatprep.mubr.f32.mxu0 %v5299_v20 }
  0xec   : > { %4032 = vmatmul.mubr.msk.f32.gmra.mrb[28].mxu0 %vm521_vm0, %v5616_v61 }
  0xed   : > { %933 = vmatprep.mubr.f32.mxu0 %v5299_v20 }
  0xf0   : > { %4033 = vmatmul.mubr.msk.f32.gmra.mrb[30].mxu0 %vm521_vm0, %v5622_v62 }
  0xf1   : > { %1078 = vmatprep.mubr.f32.mxu0 %v5299_v20 }
  0xf4   : > { %4050 = vmatmul.mubr.msk.f32.vlgmr.msra.gmra.mrb[0].mxu0 %vm521_vm0, %v5547_v47  ;;  %v4939_v47 = vld [vmem:[#allocation6 + $0x40] ss:$8 sps:$4 sm:$0xff]  }
  0xf5   : > { %4462 = vmatpush1.bf16.msra.mxu0 %v4461_v17  ;;  %1084 = vmatprep.mubr.f32.mxu0 %v5299_v20  ;;  %v5839_v17 = vrot.slane %v1741_v13, %v5830_v12 }
  0xf6   : > { %4464 = vmatprep.subr.bf16.mxu0 %v4463_v18  ;;  %2970 = vmatpush1.bf16.msra.mxu1 %v4939_v47  ;;  %v1785_v18 = vld [vmem:[%s6632_s3] sm:$0x3] }
  0xf7   : > { %2971 = vmatprep.subr.bf16.mxu1 %v4940_v48  ;;  %v5853_v27 = vrot.slane %v1785_v18, %v5835_v14 }
  0xf8   : > { %4051 = vmatmul.mubr.msk.f32.gmra.mrb[2].mxu0 %vm521_vm0, %v5550_v50 }
  0xf9   : > { %1090 = vmatprep.mubr.f32.mxu0 %v5299_v20  ;;  %4466 = vmatpush1.bf16.msra.mxu0 %v4465_v24  ;;  %v5849_v24 = vrot.slane %v1785_v18, %v5830_v12  ;;  %v4994_v18 = vld [vmem:[#allocation6 + $0x170] ss:$8 sps:$4 sm:$0xff]  }
  0xfa   : > { %4468 = vmatprep.subr.bf16.mxu0 %v4467_v25  ;;  %2972 = vmatpush1.bf16.msra.mxu1 %v4942_v49 }
  0xfc   : > { %4052 = vmatmul.mubr.msk.f32.gmra.mrb[4].mxu0 %vm521_vm0, %v5556_v51 }
  0xfd   : > { %1096 = vmatprep.mubr.f32.mxu0 %v5299_v20 }
 0x100   : > { %4053 = vmatmul.mubr.msk.f32.gmra.mrb[6].mxu0 %vm521_vm0, %v5562_v52 }
 0x101   : > { %1102 = vmatprep.mubr.f32.mxu0 %v5299_v20 }
 0x104   : > { %4054 = vmatmul.mubr.msk.f32.gmra.mrb[8].mxu0 %vm521_vm0, %v5568_v53 }
 0x105   : > { %1108 = vmatprep.mubr.f32.mxu0 %v5299_v20 }
 0x108   : > { %4055 = vmatmul.mubr.msk.f32.gmra.mrb[10].mxu0 %vm521_vm0, %v5574_v54 }
 0x109   : > { %1114 = vmatprep.mubr.f32.mxu0 %v5299_v20 }
 0x10c   : > { %4056 = vmatmul.mubr.msk.f32.gmra.mrb[12].mxu0 %vm521_vm0, %v5580_v55 }
 0x10d   : > { %1120 = vmatprep.mubr.f32.mxu0 %v5299_v20 }
 0x110   : > { %4057 = vmatmul.mubr.msk.f32.gmra.mrb[14].mxu0 %vm521_vm0, %v5586_v56 }
 0x111   : > { %1126 = vmatprep.mubr.f32.mxu0 %v5299_v20 }
 0x114   : > { %4058 = vmatmul.mubr.msk.f32.gmra.mrb[16].mxu0 %vm521_vm0, %v5595_v57 }
 0x115   : > { %1132 = vmatprep.mubr.f32.mxu0 %v5299_v20 }
 0x118   : > { %4059 = vmatmul.mubr.msk.f32.gmra.mrb[18].mxu0 %vm521_vm0, %v5598_v58 }
 0x119   : > { %1138 = vmatprep.mubr.f32.mxu0 %v5299_v20 }
 0x11c   : > { %4060 = vmatmul.mubr.msk.f32.gmra.mrb[20].mxu0 %vm521_vm0, %v5604_v59 }
 0x11d   : > { %1144 = vmatprep.mubr.f32.mxu0 %v5299_v20 }
 0x120   : > { %4061 = vmatmul.mubr.msk.f32.gmra.mrb[22].mxu0 %vm521_vm0, %v5610_v60 }
 0x121   : > { %1150 = vmatprep.mubr.f32.mxu0 %v5299_v20 }
 0x124   : > { %4062 = vmatmul.mubr.msk.f32.gmra.mrb[24].mxu0 %vm521_vm0, %v5616_v61 }
 0x125   : > { %1156 = vmatprep.mubr.f32.mxu0 %v5299_v20 }
 0x128   : > { %4063 = vmatmul.mubr.msk.f32.gmra.mrb[26].mxu0 %vm521_vm0, %v5622_v62 }
 0x129   : > { %1162 = vmatprep.mubr.f32.mxu0 %v5299_v20 }
 0x12c   : > { %4064 = vmatmul.mubr.msk.f32.gmra.mrb[28].mxu0 %vm521_vm0, %v5628_v63 }
 0x12d   : > { %1168 = vmatprep.mubr.f32.mxu0 %v5299_v20 }
 0x130   : > { %4065 = vmatmul.mubr.msk.f32.gmra.mrb[30].mxu0 %vm521_vm0, %v5730_v26 }
 0x131   : > { %1345 = vmatprep.mubr.f32.mxu0 %v5299_v20 }
 0x134   : > { %4082 = vmatmul.mubr.msk.f32.vlgmr.msra.gmra.mrb[0].mxu0 %vm521_vm0, %v5550_v50  ;;  %v4943_v50 = vld [vmem:[#allocation6 + $0x64] ss:$8 sps:$4 sm:$0xff]  }
 0x135   : > { %4470 = vmatpush1.bf16.msra.mxu0 %v4469_v31  ;;  %1351 = vmatprep.mubr.f32.mxu0 %v5299_v20 }
 0x136   : > { %4472 = vmatprep.subr.bf16.mxu0 %v4471_v32  ;;  %2973 = vmatprep.subr.bf16.mxu1 %v4943_v50 }
 0x138   : > { %4083 = vmatmul.mubr.msk.f32.gmra.mrb[2].mxu0 %vm521_vm0, %v5556_v51 }
 0x139   : > { %1357 = vmatprep.mubr.f32.mxu0 %v5299_v20  ;;  %4474 = vmatpush1.bf16.msra.mxu0 %v4473_v35 }
 0x13c   : > { %4084 = vmatmul.mubr.msk.f32.gmra.mrb[4].mxu0 %vm521_vm0, %v5562_v52 }
 0x13d   : > { %1363 = vmatprep.mubr.f32.mxu0 %v5299_v20 }
 0x140   : > { %4085 = vmatmul.mubr.msk.f32.gmra.mrb[6].mxu0 %vm521_vm0, %v5568_v53 }
 0x141   : > { %1369 = vmatprep.mubr.f32.mxu0 %v5299_v20 }
 0x144   : > { %4086 = vmatmul.mubr.msk.f32.gmra.mrb[8].mxu0 %vm521_vm0, %v5574_v54 }
 0x145   : > { %1375 = vmatprep.mubr.f32.mxu0 %v5299_v20 }
 0x148   : > { %4087 = vmatmul.mubr.msk.f32.gmra.mrb[10].mxu0 %vm521_vm0, %v5580_v55 }
 0x149   : > { %1381 = vmatprep.mubr.f32.mxu0 %v5299_v20 }
 0x14c   : > { %4088 = vmatmul.mubr.msk.f32.gmra.mrb[12].mxu0 %vm521_vm0, %v5586_v56 }
 0x14d   : > { %1387 = vmatprep.mubr.f32.mxu0 %v5299_v20 }
 0x150   : > { %4089 = vmatmul.mubr.msk.f32.gmra.mrb[14].mxu0 %vm521_vm0, %v5595_v57 }
 0x151   : > { %1393 = vmatprep.mubr.f32.mxu0 %v5299_v20 }
 0x154   : > { %4090 = vmatmul.mubr.msk.f32.gmra.mrb[16].mxu0 %vm521_vm0, %v5598_v58 }
 0x155   : > { %1399 = vmatprep.mubr.f32.mxu0 %v5299_v20 }
 0x158   : > { %4091 = vmatmul.mubr.msk.f32.gmra.mrb[18].mxu0 %vm521_vm0, %v5604_v59 }
 0x159   : > { %1405 = vmatprep.mubr.f32.mxu0 %v5299_v20 }
 0x15c   : > { %4092 = vmatmul.mubr.msk.f32.gmra.mrb[20].mxu0 %vm521_vm0, %v5610_v60 }
 0x15d   : > { %1411 = vmatprep.mubr.f32.mxu0 %v5299_v20 }
 0x160   : > { %4093 = vmatmul.mubr.msk.f32.gmra.mrb[22].mxu0 %vm521_vm0, %v5616_v61 }
 0x161   : > { %1417 = vmatprep.mubr.f32.mxu0 %v5299_v20 }
 0x164   : > { %4094 = vmatmul.mubr.msk.f32.gmra.mrb[24].mxu0 %vm521_vm0, %v5622_v62 }
 0x165   : > { %1423 = vmatprep.mubr.f32.mxu0 %v5299_v20 }
 0x168   : > { %4095 = vmatmul.mubr.msk.f32.gmra.mrb[26].mxu0 %vm521_vm0, %v5628_v63 }
 0x169   : > { %1429 = vmatprep.mubr.f32.mxu0 %v5299_v20 }
 0x16c   : > { %4096 = vmatmul.mubr.msk.f32.gmra.mrb[28].mxu0 %vm521_vm0, %v5730_v26 }
 0x16d   : > { %1435 = vmatprep.mubr.f32.mxu0 %v5299_v20 }
 0x170   : > { %4097 = vmatmul.mubr.msk.f32.gmra.mrb[30].mxu0 %vm521_vm0, %v4081_v36 }
 0x171   : > { %1612 = vmatprep.mubr.f32.mxu0 %v5299_v20 }
 0x174   : > { %4114 = vmatmul.mubr.msk.f32.vlgmr.msra.gmra.mrb[0].mxu0 %vm521_vm0, %v5556_v51  ;;  %v4945_v51 = vld [vmem:[#allocation6 + $0x60] ss:$8 sps:$4 sm:$0xff]  }
 0x175   : > { %1618 = vmatprep.mubr.f32.mxu0 %v5299_v20  ;;  %2974 = vmatpush1.bf16.msra.mxu1 %v4945_v51  ;;  %v4990_v51 = vld [vmem:[#allocation6 + $0x154] ss:$8 sps:$4 sm:$0xff]  }
 0x178   : > { %4115 = vmatmul.mubr.msk.f32.gmra.mrb[2].mxu0 %vm521_vm0, %v5562_v52  ;;  %v4946_v52 = vld [vmem:[#allocation6 + $0x74] ss:$8 sps:$4 sm:$0xff]  }
 0x179   : > { %1624 = vmatprep.mubr.f32.mxu0 %v5299_v20  ;;  %2975 = vmatprep.subr.bf16.mxu1 %v4946_v52 }
 0x17c   : > { %4116 = vmatmul.mubr.msk.f32.gmra.mrb[4].mxu0 %vm521_vm0, %v5568_v53  ;;  %v5300_v53 = vmov 0.0|0.0  }
 0x17d   : > { %1630 = vmatprep.mubr.f32.mxu0 %v5299_v20  ;;  %2993 = vmatprep.mubr.bf16.mxu1 %v5300_v53 }
 0x180   : > { %4117 = vmatmul.mubr.msk.f32.gmra.mrb[6].mxu0 %vm521_vm0, %v5574_v54  ;;  %v4948_v54 = vld [vmem:[#allocation6 + $0x70] ss:$8 sps:$4 sm:$0xff]  }
 0x181   : > { %1636 = vmatprep.mubr.f32.mxu0 %v5299_v20  ;;  %2976 = vmatpush1.bf16.msra.mxu1 %v4948_v54 }
 0x184   : > { %4118 = vmatmul.mubr.msk.f32.gmra.mrb[8].mxu0 %vm521_vm0, %v5580_v55  ;;  %v4949_v55 = vld [vmem:[#allocation6 + $0x84] ss:$8 sps:$4 sm:$0xff]  }
 0x185   : > { %1642 = vmatprep.mubr.f32.mxu0 %v5299_v20  ;;  %2977 = vmatprep.subr.bf16.mxu1 %v4949_v55 }
 0x188   : > { %4119 = vmatmul.mubr.msk.f32.gmra.mrb[10].mxu0 %vm521_vm0, %v5586_v56  ;;  %v4951_v56 = vld [vmem:[#allocation6 + $0x80] ss:$8 sps:$4 sm:$0xff]  }
 0x189   : > { %1648 = vmatprep.mubr.f32.mxu0 %v5299_v20  ;;  %2978 = vmatpush1.bf16.msra.mxu1 %v4951_v56  ;;  %v4988_v56 = vld [vmem:[#allocation6 + $0x150] ss:$8 sps:$4 sm:$0xff]  }
 0x18c   : > { %4120 = vmatmul.mubr.msk.f32.gmra.mrb[12].mxu0 %vm521_vm0, %v5595_v57  ;;  %v4952_v57 = vld [vmem:[#allocation6 + $0x94] ss:$8 sps:$4 sm:$0xff]  }
 0x18d   : > { %1654 = vmatprep.mubr.f32.mxu0 %v5299_v20  ;;  %2979 = vmatprep.subr.bf16.mxu1 %v4952_v57 }
 0x190   : > { %4121 = vmatmul.mubr.msk.f32.gmra.mrb[14].mxu0 %vm521_vm0, %v5598_v58  ;;  %v4954_v58 = vld [vmem:[#allocation6 + $0x90] ss:$8 sps:$4 sm:$0xff]  }
 0x191   : > { %1660 = vmatprep.mubr.f32.mxu0 %v5299_v20  ;;  %2980 = vmatpush1.bf16.msra.mxu1 %v4954_v58 }
 0x194   : > { %4122 = vmatmul.mubr.msk.f32.gmra.mrb[16].mxu0 %vm521_vm0, %v5604_v59  ;;  %v4955_v59 = vld [vmem:[#allocation6 + $0xa4] ss:$8 sps:$4 sm:$0xff]  }
 0x195   : > { %1666 = vmatprep.mubr.f32.mxu0 %v5299_v20  ;;  %2981 = vmatprep.subr.bf16.mxu1 %v4955_v59 }
 0x198   : > { %4123 = vmatmul.mubr.msk.f32.gmra.mrb[18].mxu0 %vm521_vm0, %v5610_v60  ;;  %v4957_v60 = vld [vmem:[#allocation6 + $0xa0] ss:$8 sps:$4 sm:$0xff]  }
 0x199   : > { %1672 = vmatprep.mubr.f32.mxu0 %v5299_v20  ;;  %2982 = vmatpush1.bf16.msra.mxu1 %v4957_v60 }
 0x19c   : > { %4124 = vmatmul.mubr.msk.f32.gmra.mrb[20].mxu0 %vm521_vm0, %v5616_v61  ;;  %v4958_v61 = vld [vmem:[#allocation6 + $0xb4] ss:$8 sps:$4 sm:$0xff]  }
 0x19d   : > { %1678 = vmatprep.mubr.f32.mxu0 %v5299_v20  ;;  %2983 = vmatprep.subr.bf16.mxu1 %v4958_v61 }
 0x1a0   : > { %4125 = vmatmul.mubr.msk.f32.gmra.mrb[22].mxu0 %vm521_vm0, %v5622_v62  ;;  %v4960_v62 = vld [vmem:[#allocation6 + $0xb0] ss:$8 sps:$4 sm:$0xff]  }
 0x1a1   : > { %1684 = vmatprep.mubr.f32.mxu0 %v5299_v20  ;;  %2984 = vmatpush1.bf16.msra.mxu1 %v4960_v62 }
 0x1a4   : > { %4126 = vmatmul.mubr.msk.f32.gmra.mrb[24].mxu0 %vm521_vm0, %v5628_v63  ;;  %v4961_v63 = vld [vmem:[#allocation6 + $0xc4] ss:$8 sps:$4 sm:$0xff]  }
 0x1a5   : > { %1690 = vmatprep.mubr.f32.mxu0 %v5299_v20  ;;  %2985 = vmatprep.subr.bf16.mxu1 %v4961_v63  ;;  %v4993_v63 = vld [vmem:[#allocation6 + $0x164] ss:$8 sps:$4 sm:$0xff]  }
 0x1a6   : > { %2986 = vmatpush1.bf16.msra.mxu1 %v4963_v0 }
 0x1a7   : > { %2987 = vmatprep.subr.bf16.mxu1 %v4964_v1 }
 0x1a8   : > { %4127 = vmatmul.mubr.msk.f32.gmra.mrb[26].mxu0 %vm521_vm0, %v5730_v26 }
 0x1a9   : > { %1696 = vmatprep.mubr.f32.mxu0 %v5299_v20 }
 0x1aa   : > { %2988 = vmatpush1.bf16.msra.mxu1 %v4966_v2 }
 0x1ab   : > { %2989 = vmatprep.subr.bf16.mxu1 %v4967_v3 }
 0x1ac   : > { %4128 = vmatmul.mubr.msk.f32.gmra.mrb[28].mxu0 %vm521_vm0, %v4081_v36  ;;  %v4987_v36 = vld [vmem:[#allocation6 + $0x144] ss:$8 sps:$4 sm:$0xff]  }
 0x1ad   : > { %1702 = vmatprep.mubr.f32.mxu0 %v5299_v20 }
 0x1ae   : > { %2990 = vmatpush1.bf16.msra.mxu1 %v4969_v4  ;;  %v4991_v4 = vld [vmem:[#allocation6 + $0x160] ss:$8 sps:$4 sm:$0xff]  }
 0x1af   : > { %2991 = vmatprep.subr.bf16.mxu1 %v4970_v5 }
 0x1b0   : > { %4129 = vmatmul.mubr.msk.f32.gmra.mrb[30].mxu0 %vm521_vm0, %v4113_v37 }
 0x1b2   : > { %2992 = vmatpush1.bf16.msra.mxu1 %v4972_v7 }
 0x1b3   : > { %3034 = vmatprep.subr.bf16.mxu1 %v4975_v8 }
 0x1b5   : > { %2994 = vmatmul.mubr.bf16.vlgmr.msra.gmra.mrb[0].mxu1 %v5300_v53 }
 0x1b6   : > { %3035 = vmatpush1.bf16.msra.mxu1 %v4973_v10 }
 0x1b7   : > { %3036 = vmatprep.subr.bf16.mxu1 %v4978_v11  ;;  %v4996_v11 = vld [vmem:[#allocation6 + $0x174] ss:$8 sps:$4 sm:$0xff]  }
 0x1ba   : > { %3037 = vmatpush1.bf16.msra.mxu1 %v4976_v15 }
 0x1bb   : > { %3038 = vmatprep.subr.bf16.mxu1 %v4981_v16 }
 0x1be   : > { %3039 = vmatpush1.bf16.msra.mxu1 %v4979_v21 }
 0x1bf   : > { %3040 = vmatprep.subr.bf16.mxu1 %v4984_v29 }
 0x1c2   : > { %3041 = vmatpush1.bf16.msra.mxu1 %v4982_v33 }
 0x1c3   : > { %3042 = vmatprep.subr.bf16.mxu1 %v4987_v36 }
 0x1c6   : > { %3043 = vmatpush1.bf16.msra.mxu1 %v4985_v38 }
 0x1c7   : > { %3044 = vmatprep.subr.bf16.mxu1 %v4990_v51 }
 0x1ca   : > { %3045 = vmatpush1.bf16.msra.mxu1 %v4988_v56 }
 0x1cb   : > { %3046 = vmatprep.subr.bf16.mxu1 %v4993_v63 }
 0x1ce   : > { %3047 = vmatpush1.bf16.msra.mxu1 %v4991_v4 }
 0x1cf   : > { %3048 = vmatprep.subr.bf16.mxu1 %v4996_v11 }
 0x1d2   : > { %3049 = vmatpush1.bf16.msra.mxu1 %v4994_v18  ;;  %v5009_v18 = vld [vmem:[#allocation6 + $0x1c0] ss:$8 sps:$4 sm:$0xff]  }
 0x247   : > { %v1614_v22 = vpop.f32.mrb[0].mxu0 }
 0x248   : > { %v1753_v23 = vmul.f32 %v5839_v17, %v1614_v22  ;;  %v1616_v25 = vpop.f32.mrb[1].mxu0 }
 0x249   : > { %v1754_v26 = vmul.f32 %v5845_v19, %v1616_v25  ;;  %v4999_v25 = vld [vmem:[#allocation6 + $0x184] ss:$8 sps:$4 sm:$0xff]  }
 0x24a   : > { %v1797_v30 = vadd.f32 %v5849_v24, %v1753_v23  ;;  %3050 = vmatprep.subr.bf16.mxu1 %v4999_v25 }
 0x24b   : > { %v1620_v28 = vpop.f32.mrb[2].mxu0  ;;  %v1798_v34 = vadd.f32 %v5853_v27, %v1754_v26 }
 0x24c   : > { %v1755_v31 = vmul.f32 %v5839_v17, %v1620_v28  ;;  %v1622_v32 = vpop.f32.mrb[3].mxu0  ;;  %v1829_v41 = vmax.f32 %v1797_v30, 0.0  ;;  %v4997_v28 = vld [vmem:[#allocation6 + $0x180] ss:$8 sps:$4 sm:$0xff]  }
 0x24d   : > { %v1756_v35 = vmul.f32 %v5845_v19, %v1622_v32  ;;  %v1830_v45 = vmax.f32 %v1798_v34, 0.0  ;;  %3051 = vmatpush1.bf16.msra.mxu1 %v4997_v28 }
 0x24e   : > { %v1799_v37 = vadd.f32 %v5849_v24, %v1755_v31 }
 0x24f   : > { %v1800_v39 = vadd.f32 %v5853_v27, %v1756_v35  ;;  %v1626_v40 = vpop.f32.mrb[4].mxu0 }
 0x250   : > { %v1831_v42 = vmax.f32 %v1799_v37, 0.0  ;;  %v1757_v43 = vmul.f32 %v5839_v17, %v1626_v40  ;;  %v1628_v44 = vpop.f32.mrb[5].mxu0 }
 0x251   : > { %v1832_v46 = vmax.f32 %v1800_v39, 0.0  ;;  %v1758_v47 = vmul.f32 %v5845_v19, %v1628_v44 }
 0x252   : > { %v5863_v48 = vmax.f32 %v1829_v41, %v1831_v42  ;;  %v1801_v52 = vadd.f32 %v5849_v24, %v1757_v43  ;;  %v5002_v41 = vld [vmem:[#allocation6 + $0x194] ss:$8 sps:$4 sm:$0xff]  }
 0x253   : > { %v1632_v49 = vpop.f32.mrb[6].mxu0  ;;  %v5865_v50 = vmax.f32 %v1830_v45, %v1832_v46  ;;  %v1802_v57 = vadd.f32 %v5853_v27, %v1758_v47  ;;  %v5000_v45 = vld [vmem:[#allocation6 + $0x190] ss:$8 sps:$4 sm:$0xff]   ;;  %3052 = vmatprep.subr.bf16.mxu1 %v5002_v41 }
 0x254   : > { %v1759_v54 = vmul.f32 %v5839_v17, %v1632_v49  ;;  %v1634_v55 = vpop.f32.mrb[7].mxu0  ;;  %v1833_v0 = vmax.f32 %v1801_v52, 0.0  ;;  %3053 = vmatpush1.bf16.msra.mxu1 %v5000_v45  ;;  %v5012_v41 = vld [vmem:[#allocation6 + $0x1d0] ss:$8 sps:$4 sm:$0xff]  }
 0x255   : > { %v1760_v58 = vmul.f32 %v5845_v19, %v1634_v55  ;;  %v4865_v59 = vpack.i.bf16 %v5865_v50, %v5863_v48  ;;  %v1834_v5 = vmax.f32 %v1802_v57, 0.0  ;;  %v5005_v55 = vld [vmem:[#allocation6 + $0x1a4] ss:$8 sps:$4 sm:$0xff]  }
 0x256   : > { %v1803_v60 = vadd.f32 %v5849_v24, %v1759_v54  ;;  %3054 = vmatprep.subr.bf16.mxu1 %v5005_v55 }
 0x257   : > { %v1804_v61 = vadd.f32 %v5853_v27, %v1760_v58  ;;  %4866 = vrot.lane.b32.xlu0 %v4865_v59, %s5301_s21  ;;  %v1638_v62 = vpop.f32.mrb[8].mxu0 }
 0x258   : > { %v1835_v1 = vmax.f32 %v1803_v60, 0.0  ;;  %v1761_v2 = vmul.f32 %v5839_v17, %v1638_v62  ;;  %v1640_v3 = vpop.f32.mrb[9].mxu0  ;;  %v5003_v60 = vld [vmem:[#allocation6 + $0x1a0] ss:$8 sps:$4 sm:$0xff]  }
 0x259   : > { %v1836_v6 = vmax.f32 %v1804_v61, 0.0  ;;  %v1762_v7 = vmul.f32 %v5845_v19, %v1640_v3  ;;  %3055 = vmatpush1.bf16.msra.mxu1 %v5003_v60  ;;  %v5008_v3 = vld [vmem:[#allocation6 + $0x1b4] ss:$8 sps:$4 sm:$0xff]  }
 0x25a   : > { %v5878_v8 = vmax.f32 %v1833_v0, %v1835_v1  ;;  %v1805_v13 = vadd.f32 %v5849_v24, %v1761_v2  ;;  %3056 = vmatprep.subr.bf16.mxu1 %v5008_v3 }
 0x25b   : > { %v5880_v9 = vmax.f32 %v1834_v5, %v1836_v6  ;;  %v1644_v10 = vpop.f32.mrb[10].mxu0  ;;  %v1806_v21 = vadd.f32 %v5853_v27, %v1762_v7  ;;  %v5006_v7 = vld [vmem:[#allocation6 + $0x1b0] ss:$8 sps:$4 sm:$0xff]  }
 0x25c   : > { %v1763_v15 = vmul.f32 %v5839_v17, %v1644_v10  ;;  %v1646_v16 = vpop.f32.mrb[11].mxu0  ;;  %v1837_v31 = vmax.f32 %v1805_v13, 0.0 }
 0x25d   : > { %v1764_v22 = vmul.f32 %v5845_v19, %v1646_v16  ;;  %v4870_v23 = vpack.i.bf16 %v5880_v9, %v5878_v8  ;;  %v1838_v35 = vmax.f32 %v1806_v21, 0.0  ;;  %3057 = vmatpush1.bf16.msra.mxu1 %v5006_v7 }
 0x25e   : > { %v1807_v26 = vadd.f32 %v5849_v24, %v1763_v15  ;;  %v5011_v15 = vld [vmem:[#allocation6 + $0x1c4] ss:$8 sps:$4 sm:$0xff]  }
 0x25f   : > { %v1808_v29 = vadd.f32 %v5853_v27, %v1764_v22  ;;  %4871 = vrot.lane.b32.xlu0 %v4870_v23, %s5301_s21  ;;  %v1650_v30 = vpop.f32.mrb[12].mxu0  ;;  %3058 = vmatprep.subr.bf16.mxu1 %v5011_v15 }
 0x260   : > { %v1839_v32 = vmax.f32 %v1807_v26, 0.0  ;;  %v1765_v33 = vmul.f32 %v5839_v17, %v1650_v30  ;;  %v1652_v34 = vpop.f32.mrb[13].mxu0 }
 0x261   : > { %v1840_v36 = vmax.f32 %v1808_v29, 0.0  ;;  %v1766_v37 = vmul.f32 %v5845_v19, %v1652_v34  ;;  %3059 = vmatpush1.bf16.msra.mxu1 %v5009_v18 }
 0x262   : > { %v5893_v38 = vmax.f32 %v1837_v31, %v1839_v32  ;;  %v1809_v42 = vadd.f32 %v5849_v24, %v1765_v33 }
 0x263   : > { %v1656_v39 = vpop.f32.mrb[14].mxu0  ;;  %v5895_v40 = vmax.f32 %v1838_v35, %v1840_v36  ;;  %v1810_v46 = vadd.f32 %v5853_v27, %v1766_v37  ;;  %v5014_v35 = vld [vmem:[#allocation6 + $0x1d4] ss:$8 sps:$4 sm:$0xff]  }
 0x264   : > { %v1767_v43 = vmul.f32 %v5839_v17, %v1656_v39  ;;  %v1658_v44 = vpop.f32.mrb[15].mxu0  ;;  %v1841_v56 = vmax.f32 %v1809_v42, 0.0  ;;  %3060 = vmatprep.subr.bf16.mxu1 %v5014_v35 }
 0x265   : > { %v1768_v47 = vmul.f32 %v5845_v19, %v1658_v44  ;;  %v4875_v49 = vpack.i.bf16 %v5895_v40, %v5893_v38  ;;  %v1842_v61 = vmax.f32 %v1810_v46, 0.0  ;;  %3061 = vmatpush1.bf16.msra.mxu1 %v5012_v41 }
 0x266   : > { %v1811_v51 = vadd.f32 %v5849_v24, %v1767_v43 }
 0x267   : > { %v1812_v52 = vadd.f32 %v5853_v27, %v1768_v47  ;;  %4876 = vrot.lane.b32.xlu1 %v4875_v49, %s5301_s21  ;;  %v1662_v54 = vpop.f32.mrb[16].mxu0  ;;  %v5017_v49 = vld [vmem:[#allocation6 + $0x1e4] ss:$8 sps:$4 sm:$0xff]  }
 0x268   : > { %v1843_v57 = vmax.f32 %v1811_v51, 0.0  ;;  %v1769_v58 = vmul.f32 %v5839_v17, %v1662_v54  ;;  %v1664_v59 = vpop.f32.mrb[17].mxu0  ;;  %3062 = vmatprep.subr.bf16.mxu1 %v5017_v49 }
 0x269   : > { %v1844_v62 = vmax.f32 %v1812_v52, 0.0  ;;  %v1770_v63 = vmul.f32 %v5845_v19, %v1664_v59 }
 0x26a   : > { %v5908_v0 = vmax.f32 %v1841_v56, %v1843_v57  ;;  %v1813_v4 = vadd.f32 %v5849_v24, %v1769_v58  ;;  %v5015_v56 = vld [vmem:[#allocation6 + $0x1e0] ss:$8 sps:$4 sm:$0xff]  }
 0x26b   : > { %v5910_v1 = vmax.f32 %v1842_v61, %v1844_v62  ;;  %v1668_v2 = vpop.f32.mrb[18].mxu0  ;;  %v1814_v10 = vadd.f32 %v5853_v27, %v1770_v63  ;;  %3063 = vmatpush1.bf16.msra.mxu1 %v5015_v56  ;;  %v5020_v63 = vld [vmem:[#allocation6 + $0x1f4] ss:$8 sps:$4 sm:$0xff]  }
 0x26c   : > { %v1771_v5 = vmul.f32 %v5839_v17, %v1668_v2  ;;  %v1670_v6 = vpop.f32.mrb[19].mxu0  ;;  %v1845_v23 = vmax.f32 %v1813_v4, 0.0  ;;  %3064 = vmatprep.subr.bf16.mxu1 %v5020_v63 }
 0x26d   : > { %v1772_v11 = vmul.f32 %v5845_v19, %v1670_v6  ;;  %v4880_v13 = vpack.i.bf16 %v5910_v1, %v5908_v0  ;;  %v1846_v29 = vmax.f32 %v1814_v10, 0.0 }
 0x26e   : > { %v1815_v16 = vadd.f32 %v5849_v24, %v1771_v5  ;;  %v5018_v5 = vld [vmem:[#allocation6 + $0x1f0] ss:$8 sps:$4 sm:$0xff]  }
 0x26f   : > { %v1816_v21 = vadd.f32 %v5853_v27, %v1772_v11  ;;  %4881 = vrot.lane.b32.xlu1 %v4880_v13, %s5301_s21  ;;  %v1674_v22 = vpop.f32.mrb[20].mxu0  ;;  %v5023_v11 = vld [vmem:[#allocation6 + $0x204] ss:$8 sps:$4 sm:$0xff]   ;;  %3065 = vmatpush1.bf16.msra.mxu1 %v5018_v5 }
 0x270   : > { %v1847_v25 = vmax.f32 %v1815_v16, 0.0  ;;  %v1773_v26 = vmul.f32 %v5839_v17, %v1674_v22  ;;  %v1676_v28 = vpop.f32.mrb[21].mxu0  ;;  %3107 = vmatprep.subr.bf16.mxu1 %v5023_v11 }
 0x271   : > { %v1848_v30 = vmax.f32 %v1816_v21, 0.0  ;;  %v1774_v31 = vmul.f32 %v5845_v19, %v1676_v28 }
 0x272   : > { %v5923_v32 = vmax.f32 %v1845_v23, %v1847_v25  ;;  %v1817_v36 = vadd.f32 %v5849_v24, %v1773_v26 }
 0x273   : > { %v5925_v33 = vmax.f32 %v1846_v29, %v1848_v30  ;;  %v1680_v34 = vpop.f32.mrb[22].mxu0  ;;  %v1818_v42 = vadd.f32 %v5853_v27, %v1774_v31 }
 0x274   : > { %v1775_v37 = vmul.f32 %v5839_v17, %v1680_v34  ;;  %v1682_v39 = vpop.f32.mrb[23].mxu0  ;;  %v1849_v51 = vmax.f32 %v1817_v36, 0.0 }
 0x275   : > { %v1776_v43 = vmul.f32 %v5845_v19, %v1682_v39  ;;  %v4885_v44 = vpack.i.bf16 %v5925_v33, %v5923_v32  ;;  %v1850_v57 = vmax.f32 %v1818_v42, 0.0 }
 0x276   : > { %v1819_v45 = vadd.f32 %v5849_v24, %v1775_v37 }
 0x277   : > { %v1820_v46 = vadd.f32 %v5853_v27, %v1776_v43  ;;  %4886 = vrot.lane.b32.xlu0 %v4885_v44, %s5301_s21  ;;  %v1686_v47 = vpop.f32.mrb[24].mxu0 }
 0x278   : > { %v1851_v52 = vmax.f32 %v1819_v45, 0.0  ;;  %v1777_v54 = vmul.f32 %v5839_v17, %v1686_v47  ;;  %v1688_v55 = vpop.f32.mrb[25].mxu0 }
 0x279   : > { %v1852_v58 = vmax.f32 %v1820_v46, 0.0  ;;  %v1778_v59 = vmul.f32 %v5845_v19, %v1688_v55 }
 0x27a   : > { %v5938_v60 = vmax.f32 %v1849_v51, %v1851_v52  ;;  %v1821_v2 = vadd.f32 %v5849_v24, %v1777_v54 }
 0x27b   : > { %v5940_v61 = vmax.f32 %v1850_v57, %v1852_v58  ;;  %v1692_v62 = vpop.f32.mrb[26].mxu0  ;;  %v1822_v6 = vadd.f32 %v5853_v27, %v1778_v59 }
 0x27c   : > { %v1779_v3 = vmul.f32 %v5839_v17, %v1692_v62  ;;  %v1694_v4 = vpop.f32.mrb[27].mxu0  ;;  %v1853_v18 = vmax.f32 %v1821_v2, 0.0 }
 0x27d   : > { %v1780_v7 = vmul.f32 %v5845_v19, %v1694_v4  ;;  %v4890_v10 = vpack.i.bf16 %v5940_v61, %v5938_v60  ;;  %v1854_v25 = vmax.f32 %v1822_v6, 0.0 }
 0x27e   : > { %v1823_v13 = vadd.f32 %v5849_v24, %v1779_v3 }
 0x27f   : > { %v1824_v15 = vadd.f32 %v5853_v27, %v1780_v7  ;;  %4891 = vrot.lane.b32.xlu1 %v4890_v10, %s5301_s21  ;;  %v1698_v16 = vpop.f32.mrb[28].mxu0 }
 0x280   : > { %v1855_v21 = vmax.f32 %v1823_v13, 0.0  ;;  %v1781_v22 = vmul.f32 %v5839_v17, %v1698_v16  ;;  %v1700_v23 = vpop.f32.mrb[29].mxu0 }
 0x281   : > { %v1856_v26 = vmax.f32 %v1824_v15, 0.0  ;;  %v1782_v28 = vmul.f32 %v5845_v19, %v1700_v23 }
 0x282   : > { %v5953_v29 = vmax.f32 %v1853_v18, %v1855_v21  ;;  %v1825_v34 = vadd.f32 %v5849_v24, %v1781_v22 }
 0x283   : > { %v5955_v30 = vmax.f32 %v1854_v25, %v1856_v26  ;;  %v1704_v31 = vpop.f32.mrb[30].mxu0  ;;  %v1826_v37 = vadd.f32 %v5853_v27, %v1782_v28 }
 0x284   : > { %v1783_v35 = vmul.f32 %v5839_v17, %v1704_v31  ;;  %v1706_v36 = vpop.f32.mrb[31].mxu0  ;;  %v1857_v44 = vmax.f32 %v1825_v34, 0.0 }
 0x285   : > { %v1784_v39 = vmul.f32 %v5845_v19, %v1706_v36  ;;  %v4895_v41 = vpack.i.bf16 %v5955_v30, %v5953_v29  ;;  %v1858_v46 = vmax.f32 %v1826_v37, 0.0 }
 0x286   : > { %v1827_v42 = vadd.f32 %v5849_v24, %v1783_v35 }
 0x287   : > { %v1828_v43 = vadd.f32 %v5853_v27, %v1784_v39  ;;  %4896 = vrot.lane.b32.xlu0 %v4895_v41, %s5301_s21 }
 0x288   : > { %v1859_v45 = vmax.f32 %v1827_v42, 0.0 }
 0x289   : > { %v1860_v47 = vmax.f32 %v1828_v43, 0.0 }
 0x28a   : > { %v5966_v49 = vmax.f32 %v1857_v44, %v1859_v45 }
 0x28b   : > { %v5968_v17 = vmax.f32 %v1858_v46, %v1860_v47 }
 0x28d   : > { %v4900_v19 = vpack.i.bf16 %v5968_v17, %v5966_v49 }
 0x28f   : > { %4901 = vrot.lane.b32.xlu1 %v4900_v19, %s5301_s21  ;;  %v5021_v19 = vld [vmem:[#allocation6 + $0x200] ss:$8 sps:$4 sm:$0xff]   ;;  %s6585_s21 = scalar_lea.hbm %s6638_s9, %s4292_s26 }
 0x2c9   : > { %v4867_v51 = vpop.permute.xlu0 %4866 }
 0x2ca   : > { %v4869_v52 = vunpack.i.h.bf16 %v4867_v51  ;;  %v4868_v24 = vunpack.i.l.bf16 %v4867_v51 }
 0x2cc   : > { %v1926_v54 = vsel %vm1925_vm1, %v4868_v24, %v4869_v52  ;;  %v1958_v55 = vsel %vm1925_vm1, %v4869_v52, %v4868_v24 }
 0x2cd   : > { %v1967_v62 = vmax.f32 %v5865_v50, %v1958_v55  ;;  %v1966_v2 = vmax.f32 %v5863_v48, %v1926_v54  ;;  %v5024_v55 = vld [vmem:[#allocation6 + $0x210] ss:$8 sps:$4 sm:$0xff]  }
 0x2cf   : > { %v1984_v45 = vpack.c.bf16 %v1967_v62, %v5299_v20 }
 0x2d1   : > { %v4872_v27 = vpop.permute.xlu0 %4871 }
 0x2d2   : > { %v4874_v56 = vunpack.i.h.bf16 %v4872_v27  ;;  %v4873_v57 = vunpack.i.l.bf16 %v4872_v27 }
 0x2d4   : > { %v1927_v58 = vsel %vm1925_vm1, %v4873_v57, %v4874_v56  ;;  %v1959_v59 = vsel %vm1925_vm1, %v4874_v56, %v4873_v57 }
 0x2d5   : > { %v1969_v63 = vmax.f32 %v5880_v9, %v1959_v59  ;;  %v5981_v3 = vmax.f32 %v5878_v8, %v1927_v58  ;;  %v5029_v58 = vld [vmem:[#allocation6 + $0x224] ss:$8 sps:$4 sm:$0xff]  }
 0x2d7   : > { %v5983_v4 = vpack.c.bf16 %v1969_v63, %v1967_v62  ;;  %v5986_v5 = vpack.c.bf16 %v5981_v3, %v1966_v2 }
 0x2d9   : > { %3003 = vmatprep.mubr.bf16.mxu1 %v5983_v4  ;;  %v4877_v6 = vpop.permute.xlu1 %4876 }
 0x2da   : > { %3004 = vmatmul.mubr.bf16.gmra.mrb[4].mxu1 %v5986_v5  ;;  %v4879_v7 = vunpack.i.h.bf16 %v4877_v6  ;;  %v4878_v10 = vunpack.i.l.bf16 %v4877_v6  ;;  %v5027_v6 = vld [vmem:[#allocation6 + $0x220] ss:$8 sps:$4 sm:$0xff]  }
 0x2dc   : > { %v1928_v9 = vsel %vm1925_vm1, %v4878_v10, %v4879_v7  ;;  %v1960_v48 = vsel %vm1925_vm1, %v4879_v7, %v4878_v10 }
 0x2dd   : > { %v1971_v16 = vmax.f32 %v5895_v40, %v1960_v48  ;;  %v1970_v21 = vmax.f32 %v5893_v38, %v1928_v9  ;;  %v5033_v9 = vld [vmem:[#allocation6 + $0x240] ss:$8 sps:$4 sm:$0xff]  }
 0x2e1   : > { %v4882_v50 = vpop.permute.xlu1 %4881 }
 0x2e2   : > { %v4884_v11 = vunpack.i.h.bf16 %v4882_v50  ;;  %v4883_v8 = vunpack.i.l.bf16 %v4882_v50  ;;  %v6045_v50 = vpack.c.bf16 %v1970_v21, %v5981_v3 }
 0x2e4   : > { %v1929_v13 = vsel %vm1925_vm1, %v4883_v8, %v4884_v11  ;;  %v1961_v15 = vsel %vm1925_vm1, %v4884_v11, %v4883_v8  ;;  %v5038_v11 = vld [vmem:[#allocation6 + $0x254] ss:$8 sps:$4 sm:$0xff]   ;;  %v5036_v8 = vld [vmem:[#allocation6 + $0x250] ss:$8 sps:$4 sm:$0xff]  }
 0x2e5   : > { %v1973_v18 = vmax.f32 %v5910_v1, %v1961_v15  ;;  %v5998_v22 = vmax.f32 %v5908_v0, %v1929_v13  ;;  %v5041_v13 = vld [vmem:[#allocation6 + $0x264] ss:$8 sps:$4 sm:$0xff]   ;;  %v5039_v15 = vld [vmem:[#allocation6 + $0x260] ss:$8 sps:$4 sm:$0xff]  }
 0x2e7   : > { %v6000_v23 = vpack.c.bf16 %v1973_v18, %v1971_v16  ;;  %v6003_v25 = vpack.c.bf16 %v5998_v22, %v1970_v21  ;;  %v5042_v21 = vld [vmem:[#allocation6 + $0x270] ss:$8 sps:$4 sm:$0xff]  }
 0x2e9   : > { %3013 = vmatprep.mubr.bf16.mxu1 %v6000_v23  ;;  %v4887_v26 = vpop.permute.xlu0 %4886 }
 0x2ea   : > { %3014 = vmatmul.mubr.bf16.gmra.mrb[8].mxu1 %v6003_v25  ;;  %v4889_v28 = vunpack.i.h.bf16 %v4887_v26  ;;  %v4888_v31 = vunpack.i.l.bf16 %v4887_v26  ;;  %v5045_v26 = vld [vmem:[#allocation6 + $0x280] ss:$8 sps:$4 sm:$0xff]  }
 0x2ec   : > { %v1930_v1 = vsel %vm1925_vm1, %v4888_v31, %v4889_v28  ;;  %v1962_v38 = vsel %vm1925_vm1, %v4889_v28, %v4888_v31  ;;  %v5050_v28 = vld [vmem:[#allocation6 + $0x294] ss:$8 sps:$4 sm:$0xff]   ;;  %v5048_v31 = vld [vmem:[#allocation6 + $0x290] ss:$8 sps:$4 sm:$0xff]  }
 0x2ed   : > { %v1975_v37 = vmax.f32 %v5925_v33, %v1962_v38  ;;  %v1974_v41 = vmax.f32 %v5923_v32, %v1930_v1  ;;  %v5026_v32 = vld [vmem:[#allocation6 + $0x214] ss:$8 sps:$4 sm:$0xff]   ;;  %v5051_v1 = vld [vmem:[#allocation6 + $0x2a0] ss:$8 sps:$4 sm:$0xff]  }
 0x2ee   : > { %v5056_v38 = vld [vmem:[#allocation6 + $0x2b4] ss:$8 sps:$4 sm:$0xff]  }
 0x2ef   : > { %v6052_v48 = vpack.c.bf16 %v1974_v41, %v5998_v22  ;;  %v5047_v22 = vld [vmem:[#allocation6 + $0x284] ss:$8 sps:$4 sm:$0xff]  }
 0x2f1   : > { %v4892_v40 = vpop.permute.xlu1 %4891 }
 0x2f2   : > { %v4894_v34 = vunpack.i.h.bf16 %v4892_v40  ;;  %v4893_v0 = vunpack.i.l.bf16 %v4892_v40  ;;  %v5053_v40 = vld [vmem:[#allocation6 + $0x2a4] ss:$8 sps:$4 sm:$0xff]  }
 0x2f4   : > { %v1931_v35 = vsel %vm1925_vm1, %v4893_v0, %v4894_v34  ;;  %v1963_v36 = vsel %vm1925_vm1, %v4894_v34, %v4893_v0  ;;  %v5054_v34 = vld [vmem:[#allocation6 + $0x2b0] ss:$8 sps:$4 sm:$0xff]   ;;  %v5059_v0 = vld [vmem:[#allocation6 + $0x2c4] ss:$8 sps:$4 sm:$0xff]  }
 0x2f5   : > { %v1977_v39 = vmax.f32 %v5940_v61, %v1963_v36  ;;  %v1976_v42 = vmax.f32 %v5938_v60, %v1931_v35  ;;  %v1983_v61 = vpack.c.bf16 %v1966_v2, %v5299_v20  ;;  %v6023_v60 = vpack.c.bf16 %v1971_v16, %v1969_v63  ;;  %v5062_v35 = vld [vmem:[#allocation6 + $0x2d4] ss:$8 sps:$4 sm:$0xff]   ;;  %v5060_v36 = vld [vmem:[#allocation6 + $0x2d0] ss:$8 sps:$4 sm:$0xff]  }
 0x2f7   : > { %v6015_v43 = vpack.c.bf16 %v1977_v39, %v1975_v37  ;;  %v6017_v44 = vpack.c.bf16 %v1976_v42, %v1974_v41  ;;  %v5068_v41 = vld [vmem:[#allocation6 + $0x2f4] ss:$8 sps:$4 sm:$0xff]  }
 0x2f9   : > { %3023 = vmatprep.mubr.bf16.mxu1 %v6015_v43  ;;  %v4897_v46 = vpop.permute.xlu0 %4896 }
 0x2fa   : > { %3024 = vmatmul.mubr.bf16.gmra.mrb[12].mxu1 %v6017_v44  ;;  %v4899_v47 = vunpack.i.h.bf16 %v4897_v46  ;;  %v4898_v33 = vunpack.i.l.bf16 %v4897_v46  ;;  %v5069_v46 = vld [vmem:[#allocation6 + $0x300] ss:$8 sps:$4 sm:$0xff]  }
 0x2fb   : > { %3066 = vmatprep.mubr.bf16.mxu1 %v1984_v45  ;;  %v5071_v45 = vld [vmem:[#allocation6 + $0x304] ss:$8 sps:$4 sm:$0xff]  }
 0x2fc   : > { %v1932_v52 = vsel %vm1925_vm1, %v4898_v33, %v4899_v47  ;;  %v1964_v24 = vsel %vm1925_vm1, %v4899_v47, %v4898_v33  ;;  %v5074_v47 = vld [vmem:[#allocation6 + $0x314] ss:$8 sps:$4 sm:$0xff]   ;;  %v5072_v33 = vld [vmem:[#allocation6 + $0x310] ss:$8 sps:$4 sm:$0xff]  }
 0x2fd   : > { %v1979_v59 = vmax.f32 %v5955_v30, %v1964_v24  ;;  %v1978_v62 = vmax.f32 %v5953_v29, %v1932_v52  ;;  %v5032_v30 = vld [vmem:[#allocation6 + $0x234] ss:$8 sps:$4 sm:$0xff]   ;;  %v6047_v29 = vpack.c.bf16 %v1975_v37, %v1973_v18  ;;  %v5065_v37 = vld [vmem:[#allocation6 + $0x2e4] ss:$8 sps:$4 sm:$0xff]  }
 0x2fe   : > { %v5044_v18 = vld [vmem:[#allocation6 + $0x274] ss:$8 sps:$4 sm:$0xff]   ;;  %v5083_v52 = vld [vmem:[#allocation6 + $0x344] ss:$8 sps:$4 sm:$0xff]  }
 0x2ff   : > { %v6054_v3 = vpack.c.bf16 %v1979_v59, %v1977_v39  ;;  %v6058_v16 = vpack.c.bf16 %v1978_v62, %v1976_v42  ;;  %v5063_v39 = vld [vmem:[#allocation6 + $0x2e0] ss:$8 sps:$4 sm:$0xff]   ;;  %v5066_v42 = vld [vmem:[#allocation6 + $0x2f0] ss:$8 sps:$4 sm:$0xff]   ;;  %v5086_v24 = vld [vmem:[#allocation6 + $0x354] ss:$8 sps:$4 sm:$0xff]  }
 0x301   : > { %v4902_v51 = vpop.permute.xlu1 %4901 }
 0x302   : > { %v4904_v27 = vunpack.i.h.bf16 %v4902_v51  ;;  %v4903_v54 = vunpack.i.l.bf16 %v4902_v51  ;;  %3067 = vmatmul.mubr.bf16.vlgmr.msra.gmra.mrb[0].mxu1 %v1983_v61  ;;  %v5075_v61 = vld [vmem:[#allocation6 + $0x320] ss:$8 sps:$4 sm:$0xff]   ;;  %v5078_v51 = vld [vmem:[#allocation6 + $0x330] ss:$8 sps:$4 sm:$0xff]  }
 0x303   : > { %3108 = vmatpush1.bf16.msra.mxu1 %v5021_v19  ;;  %3076 = vmatprep.mubr.bf16.mxu1 %v6023_v60  ;;  %v5077_v19 = vld [vmem:[#allocation6 + $0x324] ss:$8 sps:$4 sm:$0xff]  }
 0x304   : > { %v1933_v56 = vsel %vm1925_vm1, %v4903_v54, %v4904_v27  ;;  %v1965_v57 = vsel %vm1925_vm1, %v4904_v27, %v4903_v54  ;;  %3109 = vmatprep.subr.bf16.mxu1 %v5026_v32  ;;  %v5080_v32 = vld [vmem:[#allocation6 + $0x334] ss:$8 sps:$4 sm:$0xff]   ;;  %v5084_v27 = vld [vmem:[#allocation6 + $0x350] ss:$8 sps:$4 sm:$0xff]   ;;  %v5089_v54 = vld [vmem:[#allocation6 + $0x364] ss:$8 sps:$4 sm:$0xff]  }
 0x305   : > { %v6033_v63 = vmax.f32 %v5968_v17, %v1965_v57  ;;  %v6036_v2 = vmax.f32 %v5966_v49, %v1933_v56  ;;  %v5030_v49 = vld [vmem:[#allocation6 + $0x230] ss:$8 sps:$4 sm:$0xff]   ;;  %v5035_v17 = vld [vmem:[#allocation6 + $0x244] ss:$8 sps:$4 sm:$0xff]   ;;  %v5092_v56 = vld [vmem:[#allocation6 + $0x374] ss:$8 sps:$4 sm:$0xff]  }
 0x306   : > { %v5090_v57 = vld [vmem:[#allocation6 + $0x370] ss:$8 sps:$4 sm:$0xff]  }
 0x307   : > { %3110 = vmatpush1.bf16.msra.mxu1 %v5024_v55  ;;  %v6039_v7 = vpack.c.bf16 %v6033_v63, %v1979_v59  ;;  %v6042_v10 = vpack.c.bf16 %v6036_v2, %v1978_v62  ;;  %v5087_v55 = vld [vmem:[#allocation6 + $0x360] ss:$8 sps:$4 sm:$0xff]   ;;  %v5098_v62 = vld [vmem:[#allocation6 + $0x394] ss:$8 sps:$4 sm:$0xff]  }
 0x308   : > { %3111 = vmatprep.subr.bf16.mxu1 %v5029_v58  ;;  %v5095_v58 = vld [vmem:[#allocation6 + $0x384] ss:$8 sps:$4 sm:$0xff]   ;;  %v5093_v59 = vld [vmem:[#allocation6 + $0x380] ss:$8 sps:$4 sm:$0xff]  }
 0x30a   : > { %3077 = vmatmul.mubr.bf16.gmra.mrb[4].mxu1 %v6045_v50 }
 0x30b   : > { %3112 = vmatpush1.bf16.msra.mxu1 %v5027_v6  ;;  %3086 = vmatprep.mubr.bf16.mxu1 %v6047_v29  ;;  %v5096_v6 = vld [vmem:[#allocation6 + $0x390] ss:$8 sps:$4 sm:$0xff]  }
 0x30c   : > { %3113 = vmatprep.subr.bf16.mxu1 %v5032_v30  ;;  %v5101_v30 = vld [vmem:[#allocation6 + $0x3a4] ss:$8 sps:$4 sm:$0xff]  }
 0x30f   : > { %3114 = vmatpush1.bf16.msra.mxu1 %v5030_v49  ;;  %v5099_v49 = vld [vmem:[#allocation6 + $0x3a0] ss:$8 sps:$4 sm:$0xff]  }
 0x310   : > { %3115 = vmatprep.subr.bf16.mxu1 %v5035_v17  ;;  %v5104_v17 = vld [vmem:[#allocation6 + $0x3b4] ss:$8 sps:$4 sm:$0xff]  }
 0x312   : > { %3087 = vmatmul.mubr.bf16.gmra.mrb[8].mxu1 %v6052_v48 }
 0x313   : > { %3116 = vmatpush1.bf16.msra.mxu1 %v5033_v9  ;;  %3096 = vmatprep.mubr.bf16.mxu1 %v6054_v3  ;;  %v5102_v9 = vld [vmem:[#allocation6 + $0x3b0] ss:$8 sps:$4 sm:$0xff]  }
 0x314   : > { %3117 = vmatprep.subr.bf16.mxu1 %v5038_v11  ;;  %v5107_v11 = vld [vmem:[#allocation6 + $0x3c4] ss:$8 sps:$4 sm:$0xff]  }
 0x317   : > { %3118 = vmatpush1.bf16.msra.mxu1 %v5036_v8  ;;  %v5110_v8 = vld [vmem:[#allocation6 + $0x3d4] ss:$8 sps:$4 sm:$0xff]  }
 0x318   : > { %3119 = vmatprep.subr.bf16.mxu1 %v5041_v13  ;;  %v5108_v13 = vld [vmem:[#allocation6 + $0x3d0] ss:$8 sps:$4 sm:$0xff]  }
 0x31a   : > { %3097 = vmatmul.mubr.bf16.gmra.mrb[12].mxu1 %v6058_v16 }
 0x31b   : > { %3120 = vmatpush1.bf16.msra.mxu1 %v5039_v15  ;;  %3139 = vmatprep.mubr.bf16.mxu1 %v5983_v4  ;;  %v5057_v4 = vld [vmem:[#allocation6 + $0x2c0] ss:$8 sps:$4 sm:$0xff]   ;;  %v5113_v15 = vld [vmem:[#allocation6 + $0x3e4] ss:$8 sps:$4 sm:$0xff]  }
 0x31c   : > { %3121 = vmatprep.subr.bf16.mxu1 %v5044_v18  ;;  %v5111_v18 = vld [vmem:[#allocation6 + $0x3e0] ss:$8 sps:$4 sm:$0xff]  }
 0x31f   : > { %3122 = vmatpush1.bf16.msra.mxu1 %v5042_v21  ;;  %v5116_v21 = vld [vmem:[#allocation6 + $0x3f4] ss:$8 sps:$4 sm:$0xff]  }
 0x320   : > { %3123 = vmatprep.subr.bf16.mxu1 %v5047_v22  ;;  %v5114_v22 = vld [vmem:[#allocation6 + $0x3f0] ss:$8 sps:$4 sm:$0xff]  }
 0x323   : > { %3124 = vmatpush1.bf16.msra.mxu1 %v5045_v26  ;;  %v5119_v26 = vld [vmem:[#allocation6 + $0x404] ss:$8 sps:$4 sm:$0xff]  }
 0x324   : > { %3125 = vmatprep.subr.bf16.mxu1 %v5050_v28  ;;  %v5117_v28 = vld [vmem:[#allocation6 + $0x400] ss:$8 sps:$4 sm:$0xff]  }
 0x327   : > { %3126 = vmatpush1.bf16.msra.mxu1 %v5048_v31  ;;  %v5122_v31 = vld [vmem:[#allocation6 + $0x414] ss:$8 sps:$4 sm:$0xff]  }
 0x328   : > { %3127 = vmatprep.subr.bf16.mxu1 %v5053_v40  ;;  %v5120_v40 = vld [vmem:[#allocation6 + $0x410] ss:$8 sps:$4 sm:$0xff]  }
 0x32b   : > { %3128 = vmatpush1.bf16.msra.mxu1 %v5051_v1  ;;  %v5125_v1 = vld [vmem:[#allocation6 + $0x424] ss:$8 sps:$4 sm:$0xff]  }
 0x32c   : > { %3129 = vmatprep.subr.bf16.mxu1 %v5056_v38  ;;  %v5123_v38 = vld [vmem:[#allocation6 + $0x420] ss:$8 sps:$4 sm:$0xff]  }
 0x32f   : > { %3130 = vmatpush1.bf16.msra.mxu1 %v5054_v34  ;;  %v5128_v34 = vld [vmem:[#allocation6 + $0x434] ss:$8 sps:$4 sm:$0xff]  }
 0x330   : > { %3131 = vmatprep.subr.bf16.mxu1 %v5059_v0  ;;  %v5126_v0 = vld [vmem:[#allocation6 + $0x430] ss:$8 sps:$4 sm:$0xff]  }
 0x333   : > { %3132 = vmatpush1.bf16.msra.mxu1 %v5057_v4  ;;  %v5131_v4 = vld [vmem:[#allocation6 + $0x444] ss:$8 sps:$4 sm:$0xff]  }
 0x334   : > { %3133 = vmatprep.subr.bf16.mxu1 %v5062_v35  ;;  %v2000_v35 = vpack.c.bf16 %v5299_v20, %v6033_v63  ;;  %v5143_v63 = vld [vmem:[#allocation6 + $0x484] ss:$8 sps:$4 sm:$0xff]  }
 0x337   : > { %3134 = vmatpush1.bf16.msra.mxu1 %v5060_v36  ;;  %v5132_v36 = vld [vmem:[#allocation6 + $0x450] ss:$8 sps:$4 sm:$0xff]  }
 0x338   : > { %3135 = vmatprep.subr.bf16.mxu1 %v5065_v37  ;;  %v1999_v37 = vpack.c.bf16 %v5299_v20, %v6036_v2  ;;  %v5152_v20 = vld [vmem:[#allocation6 + $0x4b4] ss:$8 sps:$4 sm:$0xff]   ;;  %v5150_v2 = vld [vmem:[#allocation6 + $0x4b0] ss:$8 sps:$4 sm:$0xff]  }
 0x33b   : > { %3136 = vmatpush1.bf16.msra.mxu1 %v5063_v39  ;;  %v5140_v39 = vld [vmem:[#allocation6 + $0x474] ss:$8 sps:$4 sm:$0xff]  }
 0x33c   : > { %3137 = vmatprep.subr.bf16.mxu1 %v5068_v41  ;;  %v5138_v41 = vld [vmem:[#allocation6 + $0x470] ss:$8 sps:$4 sm:$0xff]  }
 0x33f   : > { %3138 = vmatpush1.bf16.msra.mxu1 %v5066_v42  ;;  %v5146_v42 = vld [vmem:[#allocation6 + $0x494] ss:$8 sps:$4 sm:$0xff]  }
 0x340   : > { %3180 = vmatprep.subr.bf16.mxu1 %v5071_v45  ;;  %v5144_v45 = vld [vmem:[#allocation6 + $0x490] ss:$8 sps:$4 sm:$0xff]  }
 0x342   : > { %3140 = vmatmul.mubr.bf16.vlgmr.msra.gmra.mrb[0].mxu1 %v5986_v5  ;;  %v5081_v5 = vld [vmem:[#allocation6 + $0x340] ss:$8 sps:$4 sm:$0xff]  }
 0x343   : > { %3149 = vmatprep.mubr.bf16.mxu1 %v6000_v23  ;;  %3181 = vmatpush1.bf16.msra.mxu1 %v5069_v46  ;;  %v5149_v46 = vld [vmem:[#allocation6 + $0x4a4] ss:$8 sps:$4 sm:$0xff]  }
 0x344   : > { %3182 = vmatprep.subr.bf16.mxu1 %v5074_v47  ;;  %v5147_v47 = vld [vmem:[#allocation6 + $0x4a0] ss:$8 sps:$4 sm:$0xff]  }
 0x347   : > { %3183 = vmatpush1.bf16.msra.mxu1 %v5072_v33  ;;  %v5155_v33 = vld [vmem:[#allocation6 + $0x4c4] ss:$8 sps:$4 sm:$0xff]  }
 0x348   : > { %3184 = vmatprep.subr.bf16.mxu1 %v5077_v19  ;;  %v5158_v19 = vld [vmem:[#allocation6 + $0x4d4] ss:$8 sps:$4 sm:$0xff]  }
 0x34a   : > { %3150 = vmatmul.mubr.bf16.gmra.mrb[4].mxu1 %v6003_v25 }
 0x34b   : > { %3159 = vmatprep.mubr.bf16.mxu1 %v6015_v43  ;;  %3185 = vmatpush1.bf16.msra.mxu1 %v5075_v61  ;;  %v5156_v61 = vld [vmem:[#allocation6 + $0x4d0] ss:$8 sps:$4 sm:$0xff]  }
 0x34c   : > { %3186 = vmatprep.subr.bf16.mxu1 %v5080_v32  ;;  %v5161_v32 = vld [vmem:[#allocation6 + $0x4e4] ss:$8 sps:$4 sm:$0xff]  }
 0x34f   : > { %3187 = vmatpush1.bf16.msra.mxu1 %v5078_v51  ;;  %v5159_v51 = vld [vmem:[#allocation6 + $0x4e0] ss:$8 sps:$4 sm:$0xff]  }
 0x350   : > { %3188 = vmatprep.subr.bf16.mxu1 %v5083_v52  ;;  %v5164_v52 = vld [vmem:[#allocation6 + $0x4f4] ss:$8 sps:$4 sm:$0xff]  }
 0x352   : > { %3160 = vmatmul.mubr.bf16.gmra.mrb[8].mxu1 %v6017_v44 }
 0x353   : > { %3169 = vmatprep.mubr.bf16.mxu1 %v6039_v7  ;;  %3189 = vmatpush1.bf16.msra.mxu1 %v5081_v5  ;;  %v5162_v5 = vld [vmem:[#allocation6 + $0x4f0] ss:$8 sps:$4 sm:$0xff]  }
 0x354   : > { %3190 = vmatprep.subr.bf16.mxu1 %v5086_v24  ;;  %v3475_v24 = vld [vmem:[%s6636_s7 + $0x80] sm:$0xff] }
 0x357   : > { %3191 = vmatpush1.bf16.msra.mxu1 %v5084_v27 }
 0x358   : > { %3192 = vmatprep.subr.bf16.mxu1 %v5089_v54 }
 0x35a   : > { %3170 = vmatmul.mubr.bf16.gmra.mrb[12].mxu1 %v6042_v10 }
 0x35b   : > { %3193 = vmatpush1.bf16.msra.mxu1 %v5087_v55  ;;  %3212 = vmatprep.mubr.bf16.mxu1 %v6023_v60  ;;  %v5105_v60 = vld [vmem:[#allocation6 + $0x3c0] ss:$8 sps:$4 sm:$0xff]   ;;  %v3461_v55 = vld [vmem:[%s6636_s7 + $0x10] sm:$0xff] }
 0x35c   : > { %3194 = vmatprep.subr.bf16.mxu1 %v5092_v56  ;;  %v3462_v56 = vld [vmem:[%s6636_s7 + $0x18] sm:$0xff] }
 0x35f   : > { %3195 = vmatpush1.bf16.msra.mxu1 %v5090_v57  ;;  %v3479_v57 = vld [vmem:[%s6636_s7 + $0xa0] sm:$0xff] }
 0x360   : > { %3196 = vmatprep.subr.bf16.mxu1 %v5095_v58  ;;  %v3480_v58 = vld [vmem:[%s6636_s7 + $0xa8] sm:$0xff] }
 0x363   : > { %3197 = vmatpush1.bf16.msra.mxu1 %v5093_v59  ;;  %v4481_v59 = vpack.c.bf16 %v3462_v56, %v3461_v55  ;;  %v3326_v56 = vld [vmem:[%s6634_s5] sm:$0x3] }
 0x364   : > { %3198 = vmatprep.subr.bf16.mxu1 %v5098_v62  ;;  %v4483_v62 = vpack.c.bf16 %v3480_v58, %v3479_v57  ;;  %v3354_v57 = vld [vmem:[%s6635_s6] sm:$0x3]  ;;  %v6238_v58 = vrot.slane %v3326_v56, %v5830_v12 }
 0x367   : > { %3199 = vmatpush1.bf16.msra.mxu1 %v5096_v6  ;;  %v3463_v6 = vld [vmem:[%s6636_s7 + $0x20] sm:$0xff] }
 0x368   : > { %3200 = vmatprep.subr.bf16.mxu1 %v5101_v30  ;;  %v3464_v30 = vld [vmem:[%s6636_s7 + $0x28] sm:$0xff] }
 0x36b   : > { %3201 = vmatpush1.bf16.msra.mxu1 %v5099_v49  ;;  %v3481_v49 = vld [vmem:[%s6636_s7 + $0xb0] sm:$0xff] }
 0x36c   : > { %3202 = vmatprep.subr.bf16.mxu1 %v5104_v17  ;;  %v3482_v17 = vld [vmem:[%s6636_s7 + $0xb8] sm:$0xff] }
 0x36f   : > { %3203 = vmatpush1.bf16.msra.mxu1 %v5102_v9  ;;  %v3507_v9 = vld [vmem:[%s6636_s7 + $0x180] sm:$0xff] }
 0x370   : > { %3204 = vmatprep.subr.bf16.mxu1 %v5107_v11  ;;  %v3508_v11 = vld [vmem:[%s6636_s7 + $0x188] sm:$0xff] }
 0x373   : > { %3205 = vmatpush1.bf16.msra.mxu1 %v5105_v60  ;;  %v3491_v60 = vld [vmem:[%s6636_s7 + $0x100] sm:$0xff] }
 0x374   : > { %3206 = vmatprep.subr.bf16.mxu1 %v5110_v8  ;;  %v3492_v8 = vld [vmem:[%s6636_s7 + $0x108] sm:$0xff] }
 0x377   : > { %3207 = vmatpush1.bf16.msra.mxu1 %v5108_v13  ;;  %v4485_v13 = vpack.c.bf16 %v3464_v30, %v3463_v6  ;;  %v3489_v6 = vld [vmem:[%s6636_s7 + $0xf0] sm:$0xff]  ;;  %v3490_v30 = vld [vmem:[%s6636_s7 + $0xf8] sm:$0xff] }
 0x378   : > { %3208 = vmatprep.subr.bf16.mxu1 %v5113_v15  ;;  %v4507_v15 = vpack.c.bf16 %v3508_v11, %v3507_v9  ;;  %v6256_v9 = vrot.slane %v3354_v57, %v5835_v14  ;;  %v4503_v11 = vpack.c.bf16 %v3490_v30, %v3489_v6 }
 0x37b   : > { %3209 = vmatpush1.bf16.msra.mxu1 %v5111_v18  ;;  %v4509_v18 = vpack.c.bf16 %v3492_v8, %v3491_v60  ;;  %v3473_v60 = vld [vmem:[%s6636_s7 + $0x70] sm:$0xff]  ;;  %v3474_v8 = vld [vmem:[%s6636_s7 + $0x78] sm:$0xff] }
 0x37c   : > { %3210 = vmatprep.subr.bf16.mxu1 %v5116_v21  ;;  %v3509_v21 = vld [vmem:[%s6636_s7 + $0x190] sm:$0xff] }
 0x37f   : > { %3211 = vmatpush1.bf16.msra.mxu1 %v5114_v22  ;;  %v3510_v22 = vld [vmem:[%s6636_s7 + $0x198] sm:$0xff] }
 0x380   : > { %3253 = vmatprep.subr.bf16.mxu1 %v5119_v26  ;;  %v3493_v26 = vld [vmem:[%s6636_s7 + $0x110] sm:$0xff] }
 0x382   : > { %3213 = vmatmul.mubr.bf16.vlgmr.msra.gmra.mrb[0].mxu1 %v6045_v50  ;;  %v5129_v50 = vld [vmem:[#allocation6 + $0x440] ss:$8 sps:$4 sm:$0xff]  }
 0x383   : > { %3222 = vmatprep.mubr.bf16.mxu1 %v6047_v29  ;;  %3254 = vmatpush1.bf16.msra.mxu1 %v5117_v28  ;;  %v5134_v29 = vld [vmem:[#allocation6 + $0x454] ss:$8 sps:$4 sm:$0xff]   ;;  %v4487_v28 = vpack.c.bf16 %v3482_v17, %v3481_v49 }
 0x384   : > { %3255 = vmatprep.subr.bf16.mxu1 %v5122_v31  ;;  %v3465_v31 = vld [vmem:[%s6636_s7 + $0x30] sm:$0xff] }
 0x385   : > { %v3517_v49 = vld [vmem:[%s6636_s7 + $0x1d0] sm:$0xff] }
 0x387   : > { %3256 = vmatpush1.bf16.msra.mxu1 %v5120_v40  ;;  %v3466_v40 = vld [vmem:[%s6636_s7 + $0x38] sm:$0xff] }
 0x388   : > { %3257 = vmatprep.subr.bf16.mxu1 %v5125_v1  ;;  %v4511_v1 = vpack.c.bf16 %v3510_v22, %v3509_v21  ;;  %v4505_v21 = vpack.c.bf16 %v3474_v8, %v3473_v60  ;;  %v3502_v22 = vld [vmem:[%s6636_s7 + $0x158] sm:$0xff] }
 0x38a   : > { %3223 = vmatmul.mubr.bf16.gmra.mrb[4].mxu1 %v6052_v48  ;;  %v5137_v48 = vld [vmem:[#allocation6 + $0x464] ss:$8 sps:$4 sm:$0xff]  }
 0x38b   : > { %3232 = vmatprep.mubr.bf16.mxu1 %v6054_v3  ;;  %3258 = vmatpush1.bf16.msra.mxu1 %v5123_v38  ;;  %v5135_v3 = vld [vmem:[#allocation6 + $0x460] ss:$8 sps:$4 sm:$0xff]   ;;  %v3494_v38 = vld [vmem:[%s6636_s7 + $0x118] sm:$0xff] }
 0x38c   : > { %3259 = vmatprep.subr.bf16.mxu1 %v5128_v34  ;;  %v3483_v34 = vld [vmem:[%s6636_s7 + $0xc0] sm:$0xff] }
 0x38f   : > { %3260 = vmatpush1.bf16.msra.mxu1 %v5126_v0  ;;  %v3484_v0 = vld [vmem:[%s6636_s7 + $0xc8] sm:$0xff] }
 0x390   : > { %3261 = vmatprep.subr.bf16.mxu1 %v5131_v4  ;;  %v3511_v4 = vld [vmem:[%s6636_s7 + $0x1a0] sm:$0xff] }
 0x392   : > { %3233 = vmatmul.mubr.bf16.gmra.mrb[8].mxu1 %v6058_v16  ;;  %v5141_v16 = vld [vmem:[#allocation6 + $0x480] ss:$8 sps:$4 sm:$0xff]  }
 0x393   : > { %3242 = vmatprep.mubr.bf16.mxu1 %v2000_v35  ;;  %3262 = vmatpush1.bf16.msra.mxu1 %v5129_v50  ;;  %v4513_v50 = vpack.c.bf16 %v3494_v38, %v3493_v26  ;;  %v4489_v35 = vpack.c.bf16 %v3466_v40, %v3465_v31 }
 0x394   : > { %3263 = vmatprep.subr.bf16.mxu1 %v5134_v29  ;;  %v3512_v29 = vld [vmem:[%s6636_s7 + $0x1a8] sm:$0xff] }
 0x397   : > { %3264 = vmatpush1.bf16.msra.mxu1 %v5132_v36  ;;  %v3467_v36 = vld [vmem:[%s6636_s7 + $0x40] sm:$0xff] }
 0x398   : > { %3265 = vmatprep.subr.bf16.mxu1 %v5137_v48  ;;  %v4515_v48 = vpack.c.bf16 %v3512_v29, %v3511_v4  ;;  %v3539_v4 = vld [vmem:[%s6636_s7 + $0x280] sm:$0xff] }
 0x39a   : > { %3243 = vmatmul.mubr.bf16.gmra.mrb[12].mxu1 %v1999_v37  ;;  %v3496_v37 = vld [vmem:[%s6636_s7 + $0x128] sm:$0xff] }
 0x39b   : > { %3266 = vmatpush1.bf16.msra.mxu1 %v5135_v3  ;;  %3285 = vmatprep.mubr.bf16.mxu1 %v6000_v23  ;;  %v5153_v23 = vld [vmem:[#allocation6 + $0x4c0] ss:$8 sps:$4 sm:$0xff]  }
 0x39c   : > { %3267 = vmatprep.subr.bf16.mxu1 %v5140_v39  ;;  %v3495_v3 = vld [vmem:[%s6636_s7 + $0x120] sm:$0xff]  ;;  %v4491_v39 = vpack.c.bf16 %v3484_v0, %v3483_v34  ;;  %v3520_v0 = vld [vmem:[%s6636_s7 + $0x1e8] sm:$0xff] }
 0x39d   : > { %v3519_v34 = vld [vmem:[%s6636_s7 + $0x1e0] sm:$0xff] }
 0x39f   : > { %3268 = vmatpush1.bf16.msra.mxu1 %v5138_v41  ;;  %v3468_v41 = vld [vmem:[%s6636_s7 + $0x48] sm:$0xff] }
 0x3a0   : > { %3269 = vmatprep.subr.bf16.mxu1 %v5143_v63  ;;  %v3513_v63 = vld [vmem:[%s6636_s7 + $0x1b0] sm:$0xff] }
 0x3a3   : > { %3270 = vmatpush1.bf16.msra.mxu1 %v5141_v16  ;;  %v3514_v16 = vld [vmem:[%s6636_s7 + $0x1b8] sm:$0xff] }
 0x3a4   : > { %3271 = vmatprep.subr.bf16.mxu1 %v5146_v42  ;;  %v3485_v42 = vld [vmem:[%s6636_s7 + $0xd0] sm:$0xff] }
 0x3a7   : > { %3272 = vmatpush1.bf16.msra.mxu1 %v5144_v45  ;;  %v3486_v45 = vld [vmem:[%s6636_s7 + $0xd8] sm:$0xff] }
 0x3a8   : > { %3273 = vmatprep.subr.bf16.mxu1 %v5149_v46  ;;  %v4517_v46 = vpack.c.bf16 %v3496_v37, %v3495_v3  ;;  %v3504_v3 = vld [vmem:[%s6636_s7 + $0x168] sm:$0xff] }
 0x3ab   : > { %3274 = vmatpush1.bf16.msra.mxu1 %v5147_v47  ;;  %v4493_v47 = vpack.c.bf16 %v3468_v41, %v3467_v36  ;;  %v3540_v36 = vld [vmem:[%s6636_s7 + $0x288] sm:$0xff] }
 0x3ac   : > { %3275 = vmatprep.subr.bf16.mxu1 %v5152_v20  ;;  %v3469_v20 = vld [vmem:[%s6636_s7 + $0x50] sm:$0xff] }
 0x3af   : > { %3276 = vmatpush1.bf16.msra.mxu1 %v5150_v2  ;;  %v4519_v2 = vpack.c.bf16 %v3514_v16, %v3513_v63 }
 0x3b0   : > { %3277 = vmatprep.subr.bf16.mxu1 %v5155_v33  ;;  %v3497_v33 = vld [vmem:[%s6636_s7 + $0x130] sm:$0xff] }
 0x3b3   : > { %3278 = vmatpush1.bf16.msra.mxu1 %v5153_v23  ;;  %v3498_v23 = vld [vmem:[%s6636_s7 + $0x138] sm:$0xff] }
 0x3b4   : > { %3279 = vmatprep.subr.bf16.mxu1 %v5158_v19  ;;  %v4495_v19 = vpack.c.bf16 %v3486_v45, %v3485_v42 }
 0x3b7   : > { %3280 = vmatpush1.bf16.msra.mxu1 %v5156_v61  ;;  %v3470_v61 = vld [vmem:[%s6636_s7 + $0x58] sm:$0xff] }
 0x3b8   : > { %3281 = vmatprep.subr.bf16.mxu1 %v5161_v32  ;;  %v3515_v32 = vld [vmem:[%s6636_s7 + $0x1c0] sm:$0xff] }
 0x3bb   : > { %3282 = vmatpush1.bf16.msra.mxu1 %v5159_v51  ;;  %v3516_v51 = vld [vmem:[%s6636_s7 + $0x1c8] sm:$0xff] }
 0x3bc   : > { %3283 = vmatprep.subr.bf16.mxu1 %v5164_v52  ;;  %v3487_v52 = vld [vmem:[%s6636_s7 + $0xe0] sm:$0xff] }
 0x3bf   : > { %3284 = vmatpush1.bf16.msra.mxu1 %v5162_v5  ;;  %v3488_v5 = vld [vmem:[%s6636_s7 + $0xe8] sm:$0xff] }
 0x3c0   : > { %4508 = vmatprep.subr.bf16.mxu1 %v4507_v15 }
 0x3c2   : > { %3286 = vmatmul.mubr.bf16.vlgmr.msra.gmra.mrb[0].mxu1 %v6003_v25  ;;  %v3476_v25 = vld [vmem:[%s6636_s7 + $0x88] sm:$0xff] }
 0x3c3   : > { %3295 = vmatprep.mubr.bf16.mxu1 %v6015_v43  ;;  %v3459_v43 = vld [vmem:[%s6636_s7] sm:$0xff]  ;;  %4510 = vmatpush3.bf16.msra.mxu1 %v4509_v18 }
 0x3c4   : > { %4512 = vmatprep.subr.bf16.mxu1 %v4511_v1 }
 0x3c7   : > { %4514 = vmatpush3.bf16.msra.mxu1 %v4513_v50 }
 0x3c8   : > { %4516 = vmatprep.subr.bf16.mxu1 %v4515_v48  ;;  %v3503_v48 = vld [vmem:[%s6636_s7 + $0x160] sm:$0xff] }
 0x3c9   : > { %v4533_v41 = vpack.c.bf16 %v3504_v3, %v3503_v48 }
 0x3ca   : > { %3296 = vmatmul.mubr.bf16.gmra.mrb[4].mxu1 %v6017_v44  ;;  %v4475_v44 = vpack.c.bf16 %v3476_v25, %v3475_v24  ;;  %v4521_v24 = vpack.c.bf16 %v3498_v23, %v3497_v33  ;;  %v4497_v25 = vpack.c.bf16 %v3470_v61, %v3469_v20  ;;  %v3521_v20 = vld [vmem:[%s6636_s7 + $0x1f0] sm:$0xff] }
 0x3cb   : > { %3305 = vmatprep.mubr.bf16.mxu1 %v6039_v7  ;;  %v3460_v7 = vld [vmem:[%s6636_s7 + $0x8] sm:$0xff]  ;;  %4518 = vmatpush3.bf16.msra.mxu1 %v4517_v46 }
 0x3cc   : > { %v4477_v27 = vpack.c.bf16 %v3460_v7, %v3459_v43  ;;  %4476 = vmatprep.subr.bf16.mxu0 %v4475_v44  ;;  %4520 = vmatprep.subr.bf16.mxu1 %v4519_v2  ;;  %v4523_v43 = vpack.c.bf16 %v3516_v51, %v3515_v32  ;;  %v3499_v44 = vld [vmem:[%s6636_s7 + $0x140] sm:$0xff]  ;;  %v3500_v7 = vld [vmem:[%s6636_s7 + $0x148] sm:$0xff]  ;;  %v3522_v2 = vld [vmem:[%s6636_s7 + $0x1f8] sm:$0xff] }
 0x3cd   : > { %v4535_v61 = vpack.c.bf16 %v3522_v2, %v3521_v20  ;;  %v3505_v32 = vld [vmem:[%s6636_s7 + $0x170] sm:$0xff]  ;;  %v3506_v51 = vld [vmem:[%s6636_s7 + $0x178] sm:$0xff] }
 0x3ce   : > { %4478 = vmatpush3.bf16.msra.mxu0 %v4477_v27  ;;  %v3472_v27 = vld [vmem:[%s6636_s7 + $0x68] sm:$0xff] }
 0x3cf   : > { %4522 = vmatpush3.bf16.msra.mxu1 %v4521_v24 }
 0x3d0   : > { %4524 = vmatprep.subr.bf16.mxu1 %v4523_v43 }
 0x3d2   : > { %3306 = vmatmul.mubr.bf16.gmra.mrb[8].mxu1 %v6042_v10  ;;  %v3478_v10 = vld [vmem:[%s6636_s7 + $0x98] sm:$0xff] }
 0x3d3   : > { %3315 = vmatprep.mubr.bf16.mxu1 %v5300_v53 }
 0x3da   : > { %3316 = vmatmul.mubr.bf16.gmra.mrb[12].mxu1 %v5300_v53  ;;  %v3477_v53 = vld [vmem:[%s6636_s7 + $0x90] sm:$0xff] }
 0x3db   : > { %v4479_v54 = vpack.c.bf16 %v3478_v10, %v3477_v53  ;;  %v4499_v53 = vpack.c.bf16 %v3488_v5, %v3487_v52  ;;  %v3471_v10 = vld [vmem:[%s6636_s7 + $0x60] sm:$0xff] }
 0x3dc   : > { %v4501_v55 = vpack.c.bf16 %v3472_v27, %v3471_v10 }
 0x3dd   : > { %4480 = vmatprep.subr.bf16.mxu0 %v4479_v54  ;;  %v4525_v54 = vpack.c.bf16 %v3500_v7, %v3499_v44 }
 0x3de   : > { %4482 = vmatpush3.bf16.msra.mxu0 %v4481_v59  ;;  %v6241_v59 = vrot.slane %v3326_v56, %v5835_v14  ;;  %v3501_v14 = vld [vmem:[%s6636_s7 + $0x150] sm:$0xff]  ;;  %v3572_v56 = vld [vmem:[%s6636_s7 + $0x388] sm:$0xff] }
 0x3df   : > { %4484 = vmatprep.subr.bf16.mxu0 %v4483_v62  ;;  %4526 = vmatpush3.bf16.msra.mxu1 %v4525_v54  ;;  %v6244_v62 = vrot.slane %v3354_v57, %v5830_v12  ;;  %v3518_v12 = vld [vmem:[%s6636_s7 + $0x1d8] sm:$0xff]  ;;  %v4529_v31 = vpack.c.bf16 %v3502_v22, %v3501_v14  ;;  %v3571_v54 = vld [vmem:[%s6636_s7 + $0x380] sm:$0xff] }
 0x3e0   : > { %v4527_v18 = vpack.c.bf16 %v3518_v12, %v3517_v49  ;;  %v4571_v6 = vpack.c.bf16 %v3572_v56, %v3571_v54  ;;  %v3526_v56 = vld [vmem:[%s6636_s7 + $0x218] sm:$0xff] }
 0x3e2   : > { %4486 = vmatpush3.bf16.msra.mxu0 %v4485_v13  ;;  %4528 = vmatprep.subr.bf16.mxu1 %v4527_v18 }
 0x3e3   : > { %4488 = vmatprep.subr.bf16.mxu0 %v4487_v28  ;;  %4530 = vmatpush3.bf16.msra.mxu1 %v4529_v31 }
 0x3e6   : > { %4490 = vmatpush3.bf16.msra.mxu0 %v4489_v35  ;;  %v4531_v35 = vpack.c.bf16 %v3520_v0, %v3519_v34 }
 0x3e7   : > { %4492 = vmatprep.subr.bf16.mxu0 %v4491_v39  ;;  %v4539_v39 = vpack.c.bf16 %v3540_v36, %v3539_v4 }
 0x3e8   : > { %4532 = vmatprep.subr.bf16.mxu1 %v4531_v35 }
 0x3e9   : > { %4534 = vmatpush3.bf16.msra.mxu1 %v4533_v41 }
 0x3ea   : > { %4494 = vmatpush3.bf16.msra.mxu0 %v4493_v47  ;;  %4536 = vmatprep.subr.bf16.mxu1 %v4535_v61 }
 0x3eb   : > { %4496 = vmatprep.subr.bf16.mxu0 %v4495_v19 }
 0x3ee   : > { %4498 = vmatpush3.bf16.msra.mxu0 %v4497_v25  ;;  %v4537_v25 = vpack.c.bf16 %v3506_v51, %v3505_v32 }
 0x3ef   : > { %4500 = vmatprep.subr.bf16.mxu0 %v4499_v53 }
 0x3f0   : > { %4538 = vmatpush3.bf16.msra.mxu1 %v4537_v25  ;;  %v3541_v25 = vld [vmem:[%s6636_s7 + $0x290] sm:$0xff] }
 0x3f1   : > { %4572 = vmatprep.subr.bf16.mxu1 %v4571_v6 }
 0x3f2   : > { %4502 = vmatpush3.bf16.msra.mxu0 %v4501_v55 }
 0x3f3   : > { %4504 = vmatprep.subr.bf16.mxu0 %v4503_v11 }
 0x3f6   : > { %4506 = vmatpush3.bf16.msra.mxu0 %v4505_v21 }
 0x3f7   : > { %4540 = vmatprep.subr.bf16.mxu0 %v4539_v39 }
 0x495   : > { %v3287_v17 = vpop.f32.mrb[0].mxu1 }
 0x496   : > { %v3338_v13 = vmul.f32 %v6238_v58, %v3287_v17  ;;  %v3289_v15 = vpop.f32.mrb[1].mxu1 }
 0x497   : > { %v3339_v26 = vmul.f32 %v6241_v59, %v3289_v15  ;;  %v3291_v28 = vpop.f32.mrb[2].mxu1 }
 0x498   : > { %v3366_v40 = vadd.f32 %v6244_v62, %v3338_v13  ;;  %v3340_v1 = vmul.f32 %v6238_v58, %v3291_v28  ;;  %v3293_v38 = vpop.f32.mrb[3].mxu1 }
 0x499   : > { %v3367_v50 = vadd.f32 %v6256_v9, %v3339_v26  ;;  %v3341_v29 = vmul.f32 %v6241_v59, %v3293_v38 }
 0x49a   : > { %v3368_v37 = vadd.f32 %v6244_v62, %v3340_v1  ;;  %v3382_v16 = vmax.f32 %v3366_v40, 0.0 }
 0x49b   : > { %v3369_v63 = vadd.f32 %v6256_v9, %v3341_v29  ;;  %v3383_v45 = vmax.f32 %v3367_v50, 0.0 }
 0x49c   : > { %v3384_v42 = vmax.f32 %v3368_v37, 0.0 }
 0x49d   : > { %v3385_v46 = vmax.f32 %v3369_v63, 0.0  ;;  %v3297_v47 = vpop.f32.mrb[4].mxu1 }
 0x49e   : > { %v6305_v33 = vmax.f32 %v3382_v16, %v3384_v42  ;;  %v3342_v23 = vmul.f32 %v6238_v58, %v3297_v47  ;;  %v3299_v19 = vpop.f32.mrb[5].mxu1 }
 0x49f   : > { %v6314_v52 = vmax.f32 %v3383_v45, %v3385_v46  ;;  %v3343_v5 = vmul.f32 %v6241_v59, %v3299_v19  ;;  %v3301_v24 = vpop.f32.mrb[6].mxu1 }
 0x4a0   : > { %v3370_v43 = vadd.f32 %v6244_v62, %v3342_v23  ;;  %v3344_v44 = vmul.f32 %v6238_v58, %v3301_v24  ;;  %v3303_v7 = vpop.f32.mrb[7].mxu1  ;;  %v3524_v24 = vld [vmem:[%s6636_s7 + $0x208] sm:$0xff] }
 0x4a1   : > { %v3371_v53 = vadd.f32 %v6256_v9, %v3343_v5  ;;  %v3345_v10 = vmul.f32 %v6241_v59, %v3303_v7  ;;  %v4905_v27 = vpack.i.bf16 %v6314_v52, %v6305_v33 }
 0x4a2   : > { %v3372_v55 = vadd.f32 %v6244_v62, %v3344_v44  ;;  %v3386_v30 = vmax.f32 %v3370_v43, 0.0  ;;  %v3542_v43 = vld [vmem:[%s6636_s7 + $0x298] sm:$0xff] }
 0x4a3   : > { %v3373_v57 = vadd.f32 %v6256_v9, %v3345_v10  ;;  %4906 = vrot.lane.b32.xlu0 %v4905_v27, %s5302_s17  ;;  %v3387_v17 = vmax.f32 %v3371_v53, 0.0  ;;  %v4543_v54 = vpack.c.bf16 %v3542_v43, %v3541_v25  ;;  %v3533_v25 = vld [vmem:[%s6636_s7 + $0x250] sm:$0xff]  ;;  %v3534_v43 = vld [vmem:[%s6636_s7 + $0x258] sm:$0xff] }
 0x4a4   : > { %v3388_v49 = vmax.f32 %v3372_v55, 0.0  ;;  %v3525_v55 = vld [vmem:[%s6636_s7 + $0x210] sm:$0xff] }
 0x4a5   : > { %v3389_v11 = vmax.f32 %v3373_v57, 0.0  ;;  %v3307_v12 = vpop.f32.mrb[8].mxu1  ;;  %v3543_v57 = vld [vmem:[%s6636_s7 + $0x2a0] sm:$0xff]  ;;  %v4545_v6 = vpack.c.bf16 %v3526_v56, %v3525_v55  ;;  %v3580_v55 = vld [vmem:[%s6636_s7 + $0x3c8] sm:$0xff] }
 0x4a6   : > { %v6332_v60 = vmax.f32 %v3386_v30, %v3388_v49  ;;  %v3346_v8 = vmul.f32 %v6238_v58, %v3307_v12  ;;  %v3309_v13 = vpop.f32.mrb[9].mxu1  ;;  %v3527_v30 = vld [vmem:[%s6636_s7 + $0x220] sm:$0xff]  ;;  %v3528_v49 = vld [vmem:[%s6636_s7 + $0x228] sm:$0xff] }
 0x4a7   : > { %v6335_v15 = vmax.f32 %v3387_v17, %v3389_v11  ;;  %v3347_v18 = vmul.f32 %v6241_v59, %v3309_v13  ;;  %v3311_v21 = vpop.f32.mrb[10].mxu1  ;;  %v3556_v13 = vld [vmem:[%s6636_s7 + $0x308] sm:$0xff] }
 0x4a8   : > { %v3374_v14 = vadd.f32 %v6244_v62, %v3346_v8  ;;  %v3348_v22 = vmul.f32 %v6238_v58, %v3311_v21  ;;  %v3313_v26 = vpop.f32.mrb[11].mxu1  ;;  %v3555_v8 = vld [vmem:[%s6636_s7 + $0x300] sm:$0xff]  ;;  %v3546_v21 = vld [vmem:[%s6636_s7 + $0x2b8] sm:$0xff] }
 0x4a9   : > { %v3375_v28 = vadd.f32 %v6256_v9, %v3347_v18  ;;  %v3349_v31 = vmul.f32 %v6241_v59, %v3313_v26  ;;  %v4910_v40 = vpack.i.bf16 %v6335_v15, %v6332_v60  ;;  %v3545_v18 = vld [vmem:[%s6636_s7 + $0x2b0] sm:$0xff] }
 0x4aa   : > { %v3376_v1 = vadd.f32 %v6244_v62, %v3348_v22  ;;  %v3390_v34 = vmax.f32 %v3374_v14, 0.0  ;;  %v3573_v14 = vld [vmem:[%s6636_s7 + $0x390] sm:$0xff]  ;;  %v3574_v22 = vld [vmem:[%s6636_s7 + $0x398] sm:$0xff] }
 0x4ab   : > { %v3377_v38 = vadd.f32 %v6256_v9, %v3349_v31  ;;  %4911 = vrot.lane.b32.xlu1 %v4910_v40, %s5302_s17  ;;  %v3391_v4 = vmax.f32 %v3375_v28, 0.0 }
 0x4ac   : > { %v3392_v0 = vmax.f32 %v3376_v1, 0.0  ;;  %v4549_v1 = vpack.c.bf16 %v3528_v49, %v3527_v30 }
 0x4ad   : > { %v3393_v50 = vmax.f32 %v3377_v38, 0.0  ;;  %v3317_v29 = vpop.f32.mrb[12].mxu1  ;;  %v4573_v38 = vpack.c.bf16 %v3556_v13, %v3555_v8  ;;  %v3564_v8 = vld [vmem:[%s6636_s7 + $0x348] sm:$0xff]  ;;  %v3553_v13 = vld [vmem:[%s6636_s7 + $0x2f0] sm:$0xff] }
 0x4ae   : > { %v6347_v35 = vmax.f32 %v3390_v34, %v3392_v0  ;;  %v3350_v36 = vmul.f32 %v6238_v58, %v3317_v29  ;;  %v3319_v48 = vpop.f32.mrb[13].mxu1  ;;  %v3529_v34 = vld [vmem:[%s6636_s7 + $0x230] sm:$0xff]  ;;  %v3530_v0 = vld [vmem:[%s6636_s7 + $0x238] sm:$0xff]  ;;  %v3547_v29 = vld [vmem:[%s6636_s7 + $0x2c0] sm:$0xff] }
 0x4af   : > { %v6350_v3 = vmax.f32 %v3391_v4, %v3393_v50  ;;  %v3351_v37 = vmul.f32 %v6241_v59, %v3319_v48  ;;  %v3321_v39 = vpop.f32.mrb[14].mxu1  ;;  %v4551_v4 = vpack.c.bf16 %v3546_v21, %v3545_v18  ;;  %v4575_v50 = vpack.c.bf16 %v3574_v22, %v3573_v14  ;;  %v3575_v48 = vld [vmem:[%s6636_s7 + $0x3a0] sm:$0xff]  ;;  %v3554_v18 = vld [vmem:[%s6636_s7 + $0x2f8] sm:$0xff]  ;;  %v3581_v21 = vld [vmem:[%s6636_s7 + $0x3d0] sm:$0xff] }
 0x4b0   : > { %v3378_v41 = vadd.f32 %v6244_v62, %v3350_v36  ;;  %v3352_v63 = vmul.f32 %v6238_v58, %v3321_v39  ;;  %v3323_v16 = vpop.f32.mrb[15].mxu1  ;;  %v3548_v36 = vld [vmem:[%s6636_s7 + $0x2c8] sm:$0xff]  ;;  %v3582_v14 = vld [vmem:[%s6636_s7 + $0x3d8] sm:$0xff] }
 0x4b1   : > { %v3379_v42 = vadd.f32 %v6256_v9, %v3351_v37  ;;  %v3353_v45 = vmul.f32 %v6241_v59, %v3323_v16  ;;  %v4915_v46 = vpack.i.bf16 %v6350_v3, %v6347_v35  ;;  %v3576_v37 = vld [vmem:[%s6636_s7 + $0x3a8] sm:$0xff]  ;;  %v3531_v16 = vld [vmem:[%s6636_s7 + $0x240] sm:$0xff] }
 0x4b2   : > { %v3380_v47 = vadd.f32 %v6244_v62, %v3352_v63  ;;  %v3394_v2 = vmax.f32 %v3378_v41, 0.0  ;;  %v4553_v41 = vpack.c.bf16 %v3530_v0, %v3529_v34  ;;  %v3538_v34 = vld [vmem:[%s6636_s7 + $0x278] sm:$0xff]  ;;  %v3565_v0 = vld [vmem:[%s6636_s7 + $0x350] sm:$0xff] }
 0x4b3   : > { %v3381_v20 = vadd.f32 %v6256_v9, %v3353_v45  ;;  %4916 = vrot.lane.b32.xlu0 %v4915_v46, %s5302_s17  ;;  %v3395_v19 = vmax.f32 %v3379_v42, 0.0  ;;  %v3523_v9 = vld [vmem:[%s6636_s7 + $0x200] sm:$0xff]  ;;  %v3532_v42 = vld [vmem:[%s6636_s7 + $0x248] sm:$0xff] }
 0x4b4   : > { %v3396_v23 = vmax.f32 %v3380_v47, 0.0  ;;  %v4541_v27 = vpack.c.bf16 %v3524_v24, %v3523_v9  ;;  %v4555_v47 = vpack.c.bf16 %v3548_v36, %v3547_v29  ;;  %v4557_v9 = vpack.c.bf16 %v3532_v42, %v3531_v16  ;;  %v3567_v36 = vld [vmem:[%s6636_s7 + $0x360] sm:$0xff] }
 0x4b5   : > { %v3397_v61 = vmax.f32 %v3381_v20, 0.0  ;;  %v4579_v20 = vpack.c.bf16 %v3576_v37, %v3575_v48  ;;  %v3568_v48 = vld [vmem:[%s6636_s7 + $0x368] sm:$0xff] }
 0x4b6   : > { %v6362_v32 = vmax.f32 %v3394_v2, %v3396_v23  ;;  %v3559_v2 = vld [vmem:[%s6636_s7 + $0x320] sm:$0xff]  ;;  %v3560_v23 = vld [vmem:[%s6636_s7 + $0x328] sm:$0xff]  ;;  %v4597_v16 = vpack.c.bf16 %v3568_v48, %v3567_v36 }
 0x4b7   : > { %v6364_v58 = vmax.f32 %v3395_v19, %v3397_v61  ;;  %v3549_v19 = vld [vmem:[%s6636_s7 + $0x2d0] sm:$0xff]  ;;  %v3550_v61 = vld [vmem:[%s6636_s7 + $0x2d8] sm:$0xff]  ;;  %v4581_v24 = vpack.c.bf16 %v3560_v23, %v3559_v2 }
 0x4b9   : > { %v4920_v59 = vpack.i.bf16 %v6364_v58, %v6362_v32 }
 0x4bb   : > { %4921 = vrot.lane.b32.xlu1 %v4920_v59, %s5302_s17  ;;  %v3577_v59 = vld [vmem:[%s6636_s7 + $0x3b0] sm:$0xff] }
 0x515   : > { %v4907_v51 = vpop.permute.xlu0 %4906 }
 0x516   : > { %v4909_v62 = vunpack.i.h.bf16 %v4907_v51  ;;  %v4908_v5 = vunpack.i.l.bf16 %v4907_v51  ;;  %v3578_v51 = vld [vmem:[%s6636_s7 + $0x3b8] sm:$0xff] }
 0x518   : > { %v3431_v44 = vsel %vm3430_vm2, %v4908_v5, %v4909_v62  ;;  %v3447_v7 = vsel %vm3430_vm2, %v4909_v62, %v4908_v5 }
 0x519   : > { %v3451_v53 = vmax.f32 %v6305_v33, %v3431_v44  ;;  %v3452_v10 = vmax.f32 %v6314_v52, %v3447_v7  ;;  %v3544_v33 = vld [vmem:[%s6636_s7 + $0x2a8] sm:$0xff]  ;;  %v4559_v44 = vpack.c.bf16 %v3550_v61, %v3549_v19  ;;  %v4583_v7 = vpack.c.bf16 %v3578_v51, %v3577_v59  ;;  %v4290_v61 = vld [vmem:[%s6637_s8] ss:$0 sm:$0xff] }
 0x51a   : > { %v4547_v12 = vpack.c.bf16 %v3544_v33, %v3543_v57  ;;  %v4561_v57 = vpack.c.bf16 %v3534_v43, %v3533_v25 }
 0x51b   : > { %3658 = vmatprep.mubr.f32.mxu0 %v3452_v10  ;;  %v3551_v10 = vld [vmem:[%s6636_s7 + $0x2e0] sm:$0xff] }
 0x51c   : > { %3659 = vmatmul.mubr.f32.vlgmr.msra.gmra.mrb[32].mxu0 %v3451_v53  ;;  %v3561_v53 = vld [vmem:[%s6636_s7 + $0x330] sm:$0xff] }
 0x51d   : > { %4542 = vmatpush3.bf16.msra.mxu0 %v4541_v27  ;;  %v4912_v52 = vpop.permute.xlu1 %4911  ;;  %v3552_v27 = vld [vmem:[%s6636_s7 + $0x2e8] sm:$0xff] }
 0x51e   : > { %v4914_v17 = vunpack.i.h.bf16 %v4912_v52  ;;  %v4913_v11 = vunpack.i.l.bf16 %v4912_v52  ;;  %4544 = vmatprep.subr.bf16.mxu0 %v4543_v54  ;;  %v3579_v54 = vld [vmem:[%s6636_s7 + $0x3c0] sm:$0xff] }
 0x51f   : > { %v3535_v52 = vld [vmem:[%s6636_s7 + $0x260] sm:$0xff] }
 0x520   : > { %v3432_v26 = vsel %vm3430_vm2, %v4913_v11, %v4914_v17  ;;  %v3448_v28 = vsel %vm3430_vm2, %v4914_v17, %v4913_v11  ;;  %v4563_v17 = vpack.c.bf16 %v3552_v27, %v3551_v10  ;;  %v4587_v11 = vpack.c.bf16 %v3580_v55, %v3579_v54 }
 0x521   : > { %v3453_v31 = vmax.f32 %v6332_v60, %v3432_v26  ;;  %4546 = vmatpush3.bf16.msra.mxu0 %v4545_v6  ;;  %v3454_v40 = vmax.f32 %v6335_v15, %v3448_v28  ;;  %v3557_v60 = vld [vmem:[%s6636_s7 + $0x310] sm:$0xff]  ;;  %v3558_v15 = vld [vmem:[%s6636_s7 + $0x318] sm:$0xff]  ;;  %v3536_v6 = vld [vmem:[%s6636_s7 + $0x268] sm:$0xff] }
 0x522   : > { %4548 = vmatprep.subr.bf16.mxu0 %v4547_v12  ;;  %v4577_v63 = vpack.c.bf16 %v3558_v15, %v3557_v60  ;;  %v3563_v12 = vld [vmem:[%s6636_s7 + $0x340] sm:$0xff]  ;;  %v4565_v28 = vpack.c.bf16 %v3536_v6, %v3535_v52 }
 0x523   : > { %3728 = vmatprep.mubr.f32.mxu1 %v3454_v40  ;;  %v3537_v40 = vld [vmem:[%s6636_s7 + $0x270] sm:$0xff] }
 0x524   : > { %3729 = vmatmul.mubr.f32.vlgmr.msra.gmra.mrb[16].mxu1 %v3453_v31  ;;  %v4589_v31 = vpack.c.bf16 %v3564_v8, %v3563_v12  ;;  %v4569_v60 = vpack.c.bf16 %v3538_v34, %v3537_v40 }
 0x525   : > { %4550 = vmatpush3.bf16.msra.mxu0 %v4549_v1  ;;  %4574 = vmatpush3.bf16.msra.mxu1 %v4573_v38  ;;  %v6449_v39 = vpop.permute.xlu0 %4916  ;;  %v4567_v1 = vpack.c.bf16 %v3554_v18, %v3553_v13  ;;  %v4591_v38 = vpack.c.bf16 %v3582_v14, %v3581_v21 }
 0x526   : > { %v4919_v45 = vunpack.i.h.bf16 %v6449_v39  ;;  %v4918_v46 = vunpack.i.l.bf16 %v6449_v39  ;;  %4552 = vmatprep.subr.bf16.mxu0 %v4551_v4  ;;  %4576 = vmatprep.subr.bf16.mxu1 %v4575_v50  ;;  %v3583_v4 = vld [vmem:[%s6636_s7 + $0x3e0] sm:$0xff]  ;;  %v3584_v50 = vld [vmem:[%s6636_s7 + $0x3e8] sm:$0xff]  ;;  %v3569_v39 = vld [vmem:[%s6636_s7 + $0x370] sm:$0xff] }
 0x527   : > { %v4595_v29 = vpack.c.bf16 %v3584_v50, %v3583_v4 }
 0x528   : > { %v3449_v62 = vsel %vm3430_vm2, %v4919_v45, %v4918_v46  ;;  %v3433_v37 = vsel %vm3430_vm2, %v4918_v46, %v4919_v45  ;;  %v3570_v45 = vld [vmem:[%s6636_s7 + $0x378] sm:$0xff] }
 0x529   : > { %4554 = vmatpush3.bf16.msra.mxu0 %v4553_v41  ;;  %4578 = vmatpush3.bf16.msra.mxu1 %v4577_v63  ;;  %v3456_v5 = vmax.f32 %v6350_v3, %v3449_v62  ;;  %v3562_v3 = vld [vmem:[%s6636_s7 + $0x338] sm:$0xff]  ;;  %v3585_v41 = vld [vmem:[%s6636_s7 + $0x3f0] sm:$0xff]  ;;  %v3455_v42 = vmax.f32 %v6347_v35, %v3433_v37  ;;  %v4601_v46 = vpack.c.bf16 %v3570_v45, %v3569_v39 }
 0x52a   : > { %4556 = vmatprep.subr.bf16.mxu0 %v4555_v47  ;;  %4580 = vmatprep.subr.bf16.mxu1 %v4579_v20  ;;  %v4585_v33 = vpack.c.bf16 %v3562_v3, %v3561_v53  ;;  %v3586_v63 = vld [vmem:[%s6636_s7 + $0x3f8] sm:$0xff] }
 0x52b   : > { %3798 = vmatprep.mubr.f32.mxu0 %v3456_v5  ;;  %v4599_v47 = vpack.c.bf16 %v3586_v63, %v3585_v41 }
 0x52d   : > { %4558 = vmatpush3.bf16.msra.mxu0 %v4557_v9  ;;  %4582 = vmatpush3.bf16.msra.mxu1 %v4581_v24  ;;  %v4922_v56 = vpop.permute.xlu1 %4921 }
 0x52e   : > { %v4924_v30 = vunpack.i.h.bf16 %v4922_v56  ;;  %v4923_v49 = vunpack.i.l.bf16 %v4922_v56  ;;  %4560 = vmatprep.subr.bf16.mxu0 %v4559_v44  ;;  %4584 = vmatprep.subr.bf16.mxu1 %v4583_v7 }
 0x530   : > { %v3450_v22 = vsel %vm3430_vm2, %v4924_v30, %v4923_v49  ;;  %v3434_v20 = vsel %vm3430_vm2, %v4923_v49, %v4924_v30 }
 0x531   : > { %4562 = vmatpush3.bf16.msra.mxu0 %v4561_v57  ;;  %4586 = vmatpush3.bf16.msra.mxu1 %v4585_v33  ;;  %v3458_v26 = vmax.f32 %v6364_v58, %v3450_v22  ;;  %v3566_v58 = vld [vmem:[%s6636_s7 + $0x358] sm:$0xff]  ;;  %v3457_v35 = vmax.f32 %v6362_v32, %v3434_v20 }
 0x532   : > { %4564 = vmatprep.subr.bf16.mxu0 %v4563_v17  ;;  %4588 = vmatprep.subr.bf16.mxu1 %v4587_v11  ;;  %v4593_v15 = vpack.c.bf16 %v3566_v58, %v3565_v0 }
 0x533   : > { %3868 = vmatprep.mubr.f32.mxu1 %v3458_v26 }
 0x535   : > { %4566 = vmatpush3.bf16.msra.mxu0 %v4565_v28  ;;  %4590 = vmatpush3.bf16.msra.mxu1 %v4589_v31 }
 0x536   : > { %4568 = vmatprep.subr.bf16.mxu0 %v4567_v1  ;;  %4592 = vmatprep.subr.bf16.mxu1 %v4591_v38 }
 0x539   : > { %4570 = vmatpush3.bf16.msra.mxu0 %v4569_v60  ;;  %4594 = vmatpush3.bf16.msra.mxu1 %v4593_v15 }
 0x53a   : > { %4596 = vmatprep.subr.bf16.mxu1 %v4595_v29 }
 0x53c   : > { %3799 = vmatmul.mubr.f32.vlgmr.msra.gmra.mrb[34].mxu0 %v3455_v42 }
 0x53d   : > { %4598 = vmatpush3.bf16.msra.mxu1 %v4597_v16 }
 0x53e   : > { %4600 = vmatprep.subr.bf16.mxu1 %v4599_v47 }
 0x541   : > { %4602 = vmatpush3.bf16.msra.mxu1 %v4601_v46 }
 0x544   : > { %3869 = vmatmul.mubr.f32.vlgmr.msra.gmra.mrb[18].mxu1 %v3457_v35 }
 0x5ef   : > { %v4327_v2 = vpop.f32.mrb[32].mxu0 }
 0x5f0   : > { %v4328_v23 = vpop.f32.mrb[33].mxu0 }
 0x5f1   : > { %v4329_v19 = vadd.f32 %v4328_v23, %v4327_v2 }
 0x5f3   : > { %v3661_v62 = vadd.f32 %v4329_v19, %v4290_v61 }
 0x5f7   : > { %v4362_v59 = vpop.f32.mrb[16].mxu1 }
 0x5f8   : > { %v4363_v51 = vpop.f32.mrb[17].mxu1 }
 0x5f9   : > { %v4364_v5 = vadd.f32 %v4363_v51, %v4362_v59 }
 0x5fb   : > { %v3731_v9 = vadd.f32 %v4364_v5, %v3661_v62 }
 0x60f   : > { %v4397_v24 = vpop.f32.mrb[34].mxu0 }
 0x610   : > { %v4398_v25 = vpop.f32.mrb[35].mxu0 }
 0x611   : > { %v4399_v43 = vadd.f32 %v4398_v25, %v4397_v24 }
 0x613   : > { %v3801_v32 = vadd.f32 %v4399_v43, %v3731_v9 }
 0x617   : > { %v4432_v44 = vpop.f32.mrb[18].mxu1 }
 0x618   : > { %v4433_v7 = vpop.f32.mrb[19].mxu1 }
 0x619   : > { %v4434_v53 = vadd.f32 %v4433_v7, %v4432_v44 }
 0x61b   : > { %v3871_v3 = vadd.f32 %v4434_v53, %v3801_v32 }
 0x61d   : > { %3874 = vst [vmem:[%s470_s22] sm:$0xff] %v3871_v3 }
 0x61e   : > { %5234 = shalt.err (!%p5231_p2)
}
 0x61f   : > { %s5235_s27 = scalar_lea.hbm %s6585_s21, 128  ;;  %s5239_s25 = scalar_lea.hbm %s6638_s9, 256 }
 0x620   : > { %p5236_p0 = scmp.ne.s32.totalorder %s6585_s21, %s5235_s27  ;;  %p5240_p10 = scmp.lt.u32.totalorder %s6585_s21, %s6638_s9 }
 0x621   : > { %p5241_p11 = scmp.lt.u32.totalorder %s5239_s25, %s5235_s27  ;;  %p5243_p4 = scmp.lt.u32.totalorder %s5235_s27, %s6585_s21 }
 0x622   : > { %p5237_p5 = pnand %p5236_p0, %p6661_p3 }
 0x623   : > { %p5242_p12 = por %p5241_p11, %p5240_p10 }
 0x624   : > { %p5238_p6 = pneg %p5237_p5 }
 0x625   : > { %p5244_p7 = por %p5243_p4, %p5242_p12 }
 0x627   : > { %p5245_p8 = pnand %p5244_p7, %p5238_p6 }
 0x629   : > { %5248 = shalt.err (!%p5245_p8)
}
 0x62a   : > { %4805 = dma.vmem_to_hbm [thread:$0]  (%p6661_p3), %s6587_s24, 128, %s6585_s21, %s3876_s28  }
 0x62b PF: > { %s6662_s26 = sld [smem:[#allocation12_spill]]  ;;  %s6663_s22 = sld [smem:[#allocation15_spill]] }
 0x631   : > { %s3901_s30 = sand.u32 1, %s6662_s26   ;;  %p6664_p9 = scmp.ne.s32.totalorder %s6663_s22, 0 }
 0x632   : > { %s3902_s15 = scalar_lea.sflag [#allocation5], %s3901_s30 }
 0x633   : > { %p4815_p13 = pnand %p3980_p1, %p6664_p9 }
 0x635   : > { %5274 = dma.done.wait (!%p4815_p13), %s3902_s15, 128  }
 0x636   : > { %5276 = vsyncadd (!%p4815_p13), %s3902_s15, 4294967168  ;;  %s6665_s12 = sld [smem:[#allocation13_spill]]  ;;  %s6666_s29 = sld [smem:[#allocation14_spill]] }
 0x637   : > { %s6667_s30 = smov %s5283_s10  ;;  %s6668_s10 = smov %s5287_s11 }
 0x63c   : > { %p21_p2 = scmp.ge.s32.totalorder %s6665_s12, 4   ;;  %s6669_s11 = smov %s6666_s29 }
 0x63e   :  { %23 = sbr.rel (!%p21_p2) target bundleno = 5 (0x5), region = 151 }
 0x645   :  { %3907 = vsyncpa [#allocation4], 1 }
 0x646   :  { %3909 = vsyncpa [#allocation4 + $0x1], 1 }
 0x647   :  { %3910 = vsyncpa [#allocation7], 1 }
 0x648   :  { %3911 = vsyncpa [#allocation5], 1 }
 0x649   :  { %3913 = vsyncpa [#allocation5 + $0x1], 1 }

</bundles_post_ra>
